<compile_context>
chip_gen: v5e
topology: v5e:2x2
jax: 0.10.0
libtpu: 0.0.40
codegen_flags: <defaults>
</compile_context>

<pallas_src>
import jax
import jax.numpy as jnp
import numpy as np
from jax.experimental import pallas as pl
from jax.experimental.pallas import tpu as pltpu


def _round_up(a: int, b: int) -> int:
    return -(-a // b) * b


def _conv_block_kernel(xm_ref, xov_ref, g0_ref, g1_ref, o_ref):
    """One (B, 2T) output block [Yr | Yi] of the full complex convolution.

    xm_ref : (2, B, T)    re/im planes: row r holds xp[r*T : r*T+T]
    xov_ref: (2, B, OV)   re/im planes: row r holds xp[(r+1)*T : (r+1)*T+OV]
    g0_ref : (2, T, 2T)   [H0r | H0i] and [-H0i | H0r]   (main Toeplitz taps)
    g1_ref : (2, OV, 2T)  [H1r | H1i] and [-H1i | H1r]   (next-row overhang taps)
    o_ref  : (B, 2T)      f32 [Yr | Yi]
    """
    acc = jnp.dot(xm_ref[0], g0_ref[0], preferred_element_type=jnp.float32)
    acc = acc + jnp.dot(xm_ref[1], g0_ref[1], preferred_element_type=jnp.float32)
    acc = acc + jnp.dot(xov_ref[0], g1_ref[0], preferred_element_type=jnp.float32)
    acc = acc + jnp.dot(xov_ref[1], g1_ref[1], preferred_element_type=jnp.float32)
    o_ref[...] = acc


def fixed_channel_sp_forward(tx_signal, impulse_response, *,
                             tile_t=256, block_rows=512,
                             compute_dtype=jnp.bfloat16):
    """y = full complex convolution of tx_signal with impulse_response (Pallas TPU)."""
    x = jnp.asarray(tx_signal).reshape(-1).astype(jnp.complex64)
    h = jnp.asarray(impulse_response).reshape(-1).astype(jnp.complex64)
    lx = int(x.shape[0])
    lh = int(h.shape[0])
    n_out = lx + lh - 1

    assert tile_t % 128 == 0 and block_rows % 16 == 0

    # Lane width of one output row; overhang of its receptive field into the next row.
    t = max(tile_t, _round_up(max(lh - 1, 1), 128))
    ov = _round_up(max(lh - 1, 1), 128)              # 128 <= ov <= t

    n_rows = pl.cdiv(n_out, t)                       # output rows actually needed
    nb_target = pl.cdiv(n_rows, block_rows)
    b = min(block_rows, _round_up(pl.cdiv(n_rows, nb_target), 16))  # rows / grid step
    num_blocks = pl.cdiv(n_rows, b)
    r_pad = num_blocks * b

    # --- taps -> shift-invariant Toeplitz blocks (built once, VMEM resident) --------
    hr = jnp.real(h).astype(jnp.float32)
    hi = jnp.imag(h).astype(jnp.float32)

    def tap_block(row_offset, rows):
        w = row_offset + jnp.arange(rows, dtype=jnp.int32)[:, None]
        c = jnp.arange(t, dtype=jnp.int32)[None, :]
        tap = c + (lh - 1) - w
        valid = (tap >= 0) & (tap < lh)
        tap_c = jnp.clip(tap, 0, lh - 1)
        return jnp.where(valid, hr[tap_c], 0.0), jnp.where(valid, hi[tap_c], 0.0)

    h0r, h0i = tap_block(0, t)        # (t, t)
    h1r, h1i = tap_block(t, ov)       # (ov, t)
    g0 = jnp.stack([jnp.concatenate([h0r, h0i], axis=1),
                    jnp.concatenate([-h0i, h0r], axis=1)]).astype(compute_dtype)
    g1 = jnp.stack([jnp.concatenate([h1r, h1i], axis=1),
                    jnp.concatenate([-h1i, h1r], axis=1)]).astype(compute_dtype)

    # --- zero-padded planar input, streamed ~once ------------------------------------
    # xp[m] = x[m - (lh-1)] ('full' convolution left padding); output row r needs
    # xp[r*t : r*t + t + lh - 1]  = Xmain row r  (+)  Xov row r (first lh-1 of next row).
    l_flat = (r_pad + 1) * t
    xr = jnp.zeros((l_flat,), jnp.float32).at[lh - 1:lh - 1 + lx].set(
        jnp.real(x).astype(jnp.float32))
    xi = jnp.zeros((l_flat,), jnp.float32).at[lh - 1:lh - 1 + lx].set(
        jnp.imag(x).astype(jnp.float32))
    x_main = jnp.stack([xr[:r_pad * t].reshape(r_pad, t),
                        xi[:r_pad * t].reshape(r_pad, t)]).astype(compute_dtype)
    x_ov = jnp.stack([xr[t:(r_pad + 1) * t].reshape(r_pad, t)[:, :ov],
                      xi[t:(r_pad + 1) * t].reshape(r_pad, t)[:, :ov]]).astype(compute_dtype)

    # --- VMEM footprint (double-buffered blocks) and cost estimate -------------------
    item = jnp.dtype(compute_dtype).itemsize
    vmem_need = (2 * (2 * b * t) * item          # x_main block
                 + 2 * (2 * b * ov) * item       # x_ov block
                 + 2 * (2 * t * 2 * t) * item    # g0 (constant index map)
                 + 2 * (2 * ov * 2 * t) * item   # g1
                 + 2 * (b * 2 * t) * 4)          # f32 output block
    vmem_limit = int(min(max(2 * vmem_need, 16 * 2 ** 20), 48 * 2 ** 20))

    flops = int(num_blocks) * 2 * int(b) * (2 * t + 2 * ov) * (2 * t)
    bytes_accessed = int((x_main.size + x_ov.size + g0.size + g1.size) * item
                         + r_pad * 2 * t * 4)

    out = pl.pallas_call(
        _conv_block_kernel,
        out_shape=jax.ShapeDtypeStruct((r_pad, 2 * t), jnp.float32),
        grid=(num_blocks,),
        in_specs=[
            pl.BlockSpec((2, b, t), lambda j: (0, j, 0)),
            pl.BlockSpec((2, b, ov), lambda j: (0, j, 0)),
            pl.BlockSpec((2, t, 2 * t), lambda j: (0, 0, 0)),    # resident taps
            pl.BlockSpec((2, ov, 2 * t), lambda j: (0, 0, 0)),   # resident taps
        ],
        out_specs=pl.BlockSpec((b, 2 * t), lambda j: (j, 0)),
        compiler_params=pltpu.CompilerParams(
            dimension_semantics=("parallel",),
            vmem_limit_bytes=vmem_limit),
        cost_estimate=pl.CostEstimate(flops=flops, transcendentals=0,
                                      bytes_accessed=bytes_accessed),
    )(x_main, x_ov, g0, g1)

    yr = out[:, :t].reshape(-1)[:n_out]
    yi = out[:, t:].reshape(-1)[:n_out]
    return (yr + 1j * yi).astype(jnp.complex64)


if __name__ == "__main__":
    key = jax.random.PRNGKey(0)
    k1, k2, k3, k4 = jax.random.split(key, 4)

    # Small deterministic example consistent with the module: a 256-sample complex
    # signal and a 1x16 complex impulse response ("1xN vector").
    lx, lh = 256, 16
    tx_signal = (jax.random.normal(k1, (lx,), dtype=jnp.float32)
                 + 1j * jax.random.normal(k2, (lx,), dtype=jnp.float32)
                 ).astype(jnp.complex64)
    impulse_response = ((jax.random.normal(k3, (1, lh), dtype=jnp.float32)
                         + 1j * jax.random.normal(k4, (1, lh), dtype=jnp.float32))
                        * 0.25).astype(jnp.complex64)

    out = jax.jit(fixed_channel_sp_forward)(tx_signal, impulse_response)
    out = jax.block_until_ready(out)

    # Reference: full complex convolution in float64.
    ref = np.convolve(np.asarray(tx_signal).astype(np.complex128),
                      np.asarray(impulse_response).reshape(-1).astype(np.complex128),
                      mode="full")

    # bf16 MXU operands with f32 accumulation -> tolerance sized for bf16 rounding.
    np.testing.assert_allclose(np.asarray(out), ref, rtol=3e-2, atol=3e-2)
    print("KERNEL_OK")
</pallas_src>

<mosaic_0001>
module attributes {stable_mosaic.version = 11 : i64} {
  func.func @_conv_block_kernel(%arg0: i32, %arg1: memref<2x16x256xbf16, #tpu.memory_space<vmem>>, %arg2: memref<2x16x128xbf16, #tpu.memory_space<vmem>>, %arg3: memref<2x256x512xbf16, #tpu.memory_space<vmem>>, %arg4: memref<2x128x512xbf16, #tpu.memory_space<vmem>>, %arg5: memref<16x512xf32, #tpu.memory_space<vmem>>) attributes {dimension_semantics = [#tpu.dimension_semantics<parallel>], iteration_bounds = array<i64: 1>, scalar_prefetch = 0 : i64, scratch_operands = 0 : i64, tpu.core_type = #tpu.core_type<tc>, window_params = [{transform_indices = @transform_0, window_bounds = array<i64: 2, 16, 256>}, {transform_indices = @transform_1, window_bounds = array<i64: 2, 16, 128>}, {pipeline_mode = #tpu.pipeline_mode<synchronous>, transform_indices = @transform_2, window_bounds = array<i64: 2, 256, 512>}, {pipeline_mode = #tpu.pipeline_mode<synchronous>, transform_indices = @transform_3, window_bounds = array<i64: 2, 128, 512>}, {transform_indices = @transform_4, window_bounds = array<i64: 16, 512>}]} {
    %c0 = arith.constant 0 : index
    %c0_0 = arith.constant 0 : index
    %c0_1 = arith.constant 0 : index
    %0 = vector.load %arg1[%c0, %c0_0, %c0_1] : memref<2x16x256xbf16, #tpu.memory_space<vmem>>, vector<1x16x256xbf16>
    %1 = vector.shape_cast %0 : vector<1x16x256xbf16> to vector<16x256xbf16>
    %c0_2 = arith.constant 0 : index
    %c0_3 = arith.constant 0 : index
    %c0_4 = arith.constant 0 : index
    %2 = vector.load %arg3[%c0_2, %c0_3, %c0_4] : memref<2x256x512xbf16, #tpu.memory_space<vmem>>, vector<1x256x512xbf16>
    %3 = vector.shape_cast %2 : vector<1x256x512xbf16> to vector<256x512xbf16>
    %cst = arith.constant dense<0.000000e+00> : vector<16x512xf32>
    %4 = tpu.matmul %1, %3, %cst {dimension_numbers = #tpu.dot_dimension_numbers<[1], [0], [0], [1], [0, 0, 1, 1], [], []>} : vector<16x256xbf16>, vector<256x512xbf16>, vector<16x512xf32> -> vector<16x512xf32>
    %c1 = arith.constant 1 : index
    %c0_5 = arith.constant 0 : index
    %c0_6 = arith.constant 0 : index
    %5 = vector.load %arg1[%c1, %c0_5, %c0_6] : memref<2x16x256xbf16, #tpu.memory_space<vmem>>, vector<1x16x256xbf16>
    %6 = vector.shape_cast %5 : vector<1x16x256xbf16> to vector<16x256xbf16>
    %c1_7 = arith.constant 1 : index
    %c0_8 = arith.constant 0 : index
    %c0_9 = arith.constant 0 : index
    %7 = vector.load %arg3[%c1_7, %c0_8, %c0_9] : memref<2x256x512xbf16, #tpu.memory_space<vmem>>, vector<1x256x512xbf16>
    %8 = vector.shape_cast %7 : vector<1x256x512xbf16> to vector<256x512xbf16>
    %cst_10 = arith.constant dense<0.000000e+00> : vector<16x512xf32>
    %9 = tpu.matmul %6, %8, %cst_10 {dimension_numbers = #tpu.dot_dimension_numbers<[1], [0], [0], [1], [0, 0, 1, 1], [], []>} : vector<16x256xbf16>, vector<256x512xbf16>, vector<16x512xf32> -> vector<16x512xf32>
    %10 = arith.addf %4, %9 : vector<16x512xf32>
    %c0_11 = arith.constant 0 : index
    %c0_12 = arith.constant 0 : index
    %c0_13 = arith.constant 0 : index
    %11 = vector.load %arg2[%c0_11, %c0_12, %c0_13] : memref<2x16x128xbf16, #tpu.memory_space<vmem>>, vector<1x16x128xbf16>
    %12 = vector.shape_cast %11 : vector<1x16x128xbf16> to vector<16x128xbf16>
    %c0_14 = arith.constant 0 : index
    %c0_15 = arith.constant 0 : index
    %c0_16 = arith.constant 0 : index
    %13 = vector.load %arg4[%c0_14, %c0_15, %c0_16] : memref<2x128x512xbf16, #tpu.memory_space<vmem>>, vector<1x128x512xbf16>
    %14 = vector.shape_cast %13 : vector<1x128x512xbf16> to vector<128x512xbf16>
    %cst_17 = arith.constant dense<0.000000e+00> : vector<16x512xf32>
    %15 = tpu.matmul %12, %14, %cst_17 {dimension_numbers = #tpu.dot_dimension_numbers<[1], [0], [0], [1], [0, 0, 1, 1], [], []>} : vector<16x128xbf16>, vector<128x512xbf16>, vector<16x512xf32> -> vector<16x512xf32>
    %16 = arith.addf %10, %15 : vector<16x512xf32>
    %c1_18 = arith.constant 1 : index
    %c0_19 = arith.constant 0 : index
    %c0_20 = arith.constant 0 : index
    %17 = vector.load %arg2[%c1_18, %c0_19, %c0_20] : memref<2x16x128xbf16, #tpu.memory_space<vmem>>, vector<1x16x128xbf16>
    %18 = vector.shape_cast %17 : vector<1x16x128xbf16> to vector<16x128xbf16>
    %c1_21 = arith.constant 1 : index
    %c0_22 = arith.constant 0 : index
    %c0_23 = arith.constant 0 : index
    %19 = vector.load %arg4[%c1_21, %c0_22, %c0_23] : memref<2x128x512xbf16, #tpu.memory_space<vmem>>, vector<1x128x512xbf16>
    %20 = vector.shape_cast %19 : vector<1x128x512xbf16> to vector<128x512xbf16>
    %cst_24 = arith.constant dense<0.000000e+00> : vector<16x512xf32>
    %21 = tpu.matmul %18, %20, %cst_24 {dimension_numbers = #tpu.dot_dimension_numbers<[1], [0], [0], [1], [0, 0, 1, 1], [], []>} : vector<16x128xbf16>, vector<128x512xbf16>, vector<16x512xf32> -> vector<16x512xf32>
    %22 = arith.addf %16, %21 : vector<16x512xf32>
    %c0_25 = arith.constant 0 : index
    %c0_26 = arith.constant 0 : index
    %23 = vector.load %arg5[%c0_25, %c0_26] : memref<16x512xf32, #tpu.memory_space<vmem>>, vector<16x512xf32>
    tpu.vector_store %arg5[%c0_25, %c0_26], %22 {strides = array<i32>} : memref<16x512xf32, #tpu.memory_space<vmem>>, vector<16x512xf32>,
    return
  }
  func.func @transform_0(%arg0: i32) -> (i32, i32, i32) {
    %c0_i32 = arith.constant 0 : i32
    %c0_i32_0 = arith.constant 0 : i32
    %c0_i32_1 = arith.constant 0 : i32
    return %c0_i32, %arg0, %c0_i32_0 : i32, i32, i32
  }
  func.func @transform_1(%arg0: i32) -> (i32, i32, i32) {
    %c0_i32 = arith.constant 0 : i32
    %c0_i32_0 = arith.constant 0 : i32
    %c0_i32_1 = arith.constant 0 : i32
    return %c0_i32, %arg0, %c0_i32_0 : i32, i32, i32
  }
  func.func @transform_2(%arg0: i32) -> (i32, i32, i32) {
    %c0_i32 = arith.constant 0 : i32
    %c0_i32_0 = arith.constant 0 : i32
    %c0_i32_1 = arith.constant 0 : i32
    %c0_i32_2 = arith.constant 0 : i32
    return %c0_i32, %c0_i32_0, %c0_i32_1 : i32, i32, i32
  }
  func.func @transform_3(%arg0: i32) -> (i32, i32, i32) {
    %c0_i32 = arith.constant 0 : i32
    %c0_i32_0 = arith.constant 0 : i32
    %c0_i32_1 = arith.constant 0 : i32
    %c0_i32_2 = arith.constant 0 : i32
    return %c0_i32, %c0_i32_0, %c0_i32_1 : i32, i32, i32
  }
  func.func @transform_4(%arg0: i32) -> (i32, i32) {
    %c0_i32 = arith.constant 0 : i32
    %c0_i32_0 = arith.constant 0 : i32
    return %arg0, %c0_i32 : i32, i32
  }
}

</mosaic_0001>

<bundles_post_ra>
// kernel: custom-call.1
= control target key start
LH: loop header
LB: loop body
LE: loop exit
PB: predicated region body
PF: predicated region fallthrough
CT: control target
= control target key end

     0   :  { %s56_s0 = inlined_call_operand.hbm [shape: c64[256], index: 0, kind: input, shape index: {}]   ;;  %s57_s1 = inlined_call_operand.vmem [shape: f32[256], index: 1, kind: output, shape index: {}]  }
   0x1   :  { %s2_s8 = scalar_lea.hbm %s56_s0, 2 }
   0x2   :  { %3 = vsyncpa [#allocation0], 0  ;;  %s5_s9 = sshll.u32 %s2_s8, 4  ;;  %s7_s12 = sshll.u32 %s57_s1, 4  ;;  %s6_s9 = int_to_ptr.hbm [resolvable:$true] %s5_s9  ;;  %s8_s12 = int_to_ptr.vmem [resolvable:$true] %s7_s12 }
   0x3   :  { %10 = dma.hbm_to_vmem [thread:$0]  %s6_s9, 32, %s8_s12, [#allocation0] }
   0x4   :  { %38 = dma.done.wait [#allocation0], 32  }
   0x5   :  { %39 = vsyncadd [#allocation0], 4294967264 }
   0x6   :  { %13 = vsyncpa [#allocation0], 1 }

// kernel: custom-call
= control target key start
LH: loop header
LB: loop body
LE: loop exit
PB: predicated region body
PF: predicated region fallthrough
CT: control target
= control target key end

     0   :  { %2 = vsyncpa [#allocation0], 0  ;;  %s55_s0 = inlined_call_operand.hbm [shape: c64[256], index: 0, kind: input, shape index: {}]   ;;  %s56_s1 = inlined_call_operand.vmem [shape: f32[256], index: 1, kind: output, shape index: {}]  }
   0x1   :  { %s4_s8 = sshll.u32 %s55_s0, 4  ;;  %s6_s11 = sshll.u32 %s56_s1, 4  ;;  %s5_s8 = int_to_ptr.hbm [resolvable:$true] %s4_s8  ;;  %s7_s11 = int_to_ptr.vmem [resolvable:$true] %s6_s11 }
   0x2   :  { %9 = dma.hbm_to_vmem [thread:$0]  %s5_s8, 32, %s7_s11, [#allocation0] }
   0x3   :  { %37 = dma.done.wait [#allocation0], 32  }
   0x4   :  { %38 = vsyncadd [#allocation0], 4294967264 }
   0x5   :  { %12 = vsyncpa [#allocation0], 1 }

// kernel: custom-call.3
= control target key start
LH: loop header
LB: loop body
LE: loop exit
PB: predicated region body
PF: predicated region fallthrough
CT: control target
= control target key end

     0   :  { %s56_s0 = inlined_call_operand.hbm [shape: c64[1,16], index: 0, kind: input, shape index: {}]   ;;  %s57_s1 = inlined_call_operand.vmem [shape: f32[1,16], index: 1, kind: output, shape index: {}]  }
   0x1   :  { %s2_s8 = scalar_lea.hbm %s56_s0, 1 }
   0x2   :  { %3 = vsyncpa [#allocation0], 0  ;;  %s5_s9 = sshll.u32 %s2_s8, 4  ;;  %s7_s12 = sshll.u32 %s57_s1, 4  ;;  %s6_s9 = int_to_ptr.hbm [resolvable:$true] %s5_s9  ;;  %s8_s12 = int_to_ptr.vmem [resolvable:$true] %s7_s12 }
   0x3   :  { %10 = dma.hbm_to_vmem [thread:$0]  %s6_s9, 16, %s8_s12, [#allocation0] }
   0x4   :  { %38 = dma.done.wait [#allocation0], 16  }
   0x5   :  { %39 = vsyncadd [#allocation0], 4294967280 }
   0x6   :  { %13 = vsyncpa [#allocation0], 1 }

// kernel: custom-call.2
= control target key start
LH: loop header
LB: loop body
LE: loop exit
PB: predicated region body
PF: predicated region fallthrough
CT: control target
= control target key end

     0   :  { %2 = vsyncpa [#allocation0], 0  ;;  %s55_s0 = inlined_call_operand.hbm [shape: c64[1,16], index: 0, kind: input, shape index: {}]   ;;  %s56_s1 = inlined_call_operand.vmem [shape: f32[1,16], index: 1, kind: output, shape index: {}]  }
   0x1   :  { %s4_s8 = sshll.u32 %s55_s0, 4  ;;  %s6_s11 = sshll.u32 %s56_s1, 4  ;;  %s5_s8 = int_to_ptr.hbm [resolvable:$true] %s4_s8  ;;  %s7_s11 = int_to_ptr.vmem [resolvable:$true] %s6_s11 }
   0x2   :  { %9 = dma.hbm_to_vmem [thread:$0]  %s5_s8, 16, %s7_s11, [#allocation0] }
   0x3   :  { %37 = dma.done.wait [#allocation0], 16  }
   0x4   :  { %38 = vsyncadd [#allocation0], 4294967280 }
   0x5   :  { %12 = vsyncpa [#allocation0], 1 }

// kernel: custom-call.4
= control target key start
LH: loop header
LB: loop body
LE: loop exit
PB: predicated region body
PF: predicated region fallthrough
CT: control target
= control target key end

     0   :  { %s105_s0 = inlined_call_operand.vmem [shape: f32[271], index: 0, kind: input, shape index: {}]   ;;  %s106_s1 = inlined_call_operand.vmem [shape: f32[271], index: 1, kind: input, shape index: {}]   ;;  %s107_s2 = inlined_call_operand.hbm [shape: c64[271], index: 2, kind: output, shape index: {}]  }
   0x1   :  { %s3_s11 = scalar_lea.hbm %s107_s2, 4 }
   0x2   :  { %4 = vsyncpa [#allocation0], 0  ;;  %s6_s14 = sshll.u32 %s105_s0, 4  ;;  %s8_s17 = sshll.u32 %s107_s2, 4  ;;  %s7_s14 = int_to_ptr.vmem [resolvable:$true] %s6_s14  ;;  %s9_s17 = int_to_ptr.hbm [resolvable:$true] %s8_s17 }
   0x3   :  { %11 = dma.vmem_to_hbm [thread:$0]  %s7_s14, 64, %s9_s17, [#allocation0] }
   0x4   :  { %74 = dma.done.wait [#allocation0], 64  }
   0x5   :  { %75 = vsyncadd [#allocation0], 4294967232 }
   0x6   :  { %14 = vsyncpa [#allocation0], 1 }
   0x7   :  { %15 = vsyncpa [#allocation1], 0  ;;  %s17_s20 = sshll.u32 %s106_s1, 4  ;;  %s19_s21 = sshll.u32 %s3_s11, 4  ;;  %s18_s20 = int_to_ptr.vmem [resolvable:$true] %s17_s20  ;;  %s20_s21 = int_to_ptr.hbm [resolvable:$true] %s19_s21 }
   0x8   :  { %22 = dma.vmem_to_hbm [thread:$0]  %s18_s20, 64, %s20_s21, [#allocation1] }
   0x9   :  { %76 = dma.done.wait [#allocation1], 64  }
   0xa   :  { %77 = vsyncadd [#allocation1], 4294967232 }
   0xb   :  { %25 = vsyncpa [#allocation1], 1 }

// kernel: fixed_channel_sp_forward.1
= control target key start
LH: loop header
LB: loop body
LE: loop exit
PB: predicated region body
PF: predicated region fallthrough
CT: control target
= control target key end

     0   :  { %s3928_s2 = inlined_call_operand.vmem [shape: bf16[2,256,512], index: 2, kind: input, shape index: {}]   ;;  %s3929_s0 = inlined_call_operand.vmem [shape: bf16[2,16,256], index: 0, kind: input, shape index: {}]   ;;  %s3930_s3 = inlined_call_operand.vmem [shape: bf16[2,128,512], index: 3, kind: input, shape index: {}]   ;;  %s3931_s1 = inlined_call_operand.vmem [shape: bf16[2,16,128], index: 1, kind: input, shape index: {}]   ;;  %s3932_s4 = inlined_call_operand.vmem [shape: f32[16,512], index: 4, kind: output, shape index: {}]  }
   0x1   :  { %v1765_v0 = vld [vmem:[%s3928_s2 + $0x2e0] sm:$0xf]  ;;  %v2567_v1 = vld [vmem:[%s3928_s2 + $0x2ec] sm:$0xf0]  ;;  %v2565_v5 = vld [vmem:[%s3928_s2 + $0x2e4] sm:$0xf] }
   0x2   :  { %v1893_v2 = vld [vmem:[%s3928_s2 + $0x3e0] sm:$0xf]  ;;  %v1766_v3 = vor.u32 %v2567_v1, %v1765_v0  ;;  %v2599_v4 = vld [vmem:[%s3928_s2 + $0x3ec] sm:$0xf0]  ;;  %v1767_v6 = vld [vmem:[%s3928_s2 + $0x2f0] sm:$0xf0] }
   0x3   :  { %v1894_v7 = vor.u32 %v2599_v4, %v1893_v2  ;;  %v1770_v8 = vor.u32 %v2565_v5, %v1767_v6  ;;  %v2597_v9 = vld [vmem:[%s3928_s2 + $0x3e4] sm:$0xf]  ;;  %v1895_v10 = vld [vmem:[%s3928_s2 + $0x3f0] sm:$0xf0]  ;;  %v1749_v11 = vld [vmem:[%s3928_s2 + $0x2c0] sm:$0xf] }
   0x4   :  { %481 = vmatpush.bf16.msra.mxu0 %v1766_v3  ;;  %v1898_v12 = vor.u32 %v2597_v9, %v1895_v10  ;;  %v2563_v13 = vld [vmem:[%s3928_s2 + $0x2cc] sm:$0xf0]  ;;  %v1877_v14 = vld [vmem:[%s3928_s2 + $0x3c0] sm:$0xf]  ;;  %v2561_v18 = vld [vmem:[%s3928_s2 + $0x2c4] sm:$0xf] }
   0x5   :  { %v2595_v15 = vld [vmem:[%s3928_s2 + $0x3cc] sm:$0xf0]  ;;  %495 = vmatpush.bf16.msra.mxu1 %v1894_v7  ;;  %509 = vmatpush.bf16.msra.mxu2 %v1770_v8  ;;  %v1750_v16 = vor.u32 %v2563_v13, %v1749_v11  ;;  %v1751_v19 = vld [vmem:[%s3928_s2 + $0x2d0] sm:$0xf0]  ;;  %v2593_v20 = vld [vmem:[%s3928_s2 + $0x3c4] sm:$0xf] }
   0x6   :  { %v1878_v17 = vor.u32 %v2595_v15, %v1877_v14  ;;  %523 = vmatpush.bf16.msra.mxu3 %v1898_v12  ;;  %v1754_v21 = vor.u32 %v2561_v18, %v1751_v19  ;;  %v1879_v22 = vld [vmem:[%s3928_s2 + $0x3d0] sm:$0xf0]  ;;  %v1733_v23 = vld [vmem:[%s3928_s2 + $0x2a0] sm:$0xf]  ;;  %v2559_v24 = vld [vmem:[%s3928_s2 + $0x2ac] sm:$0xf0] }
   0x7   :  { %v1882_v25 = vor.u32 %v2593_v20, %v1879_v22  ;;  %v1861_v26 = vld [vmem:[%s3928_s2 + $0x3a0] sm:$0xf]  ;;  %v2591_v27 = vld [vmem:[%s3928_s2 + $0x3ac] sm:$0xf0]  ;;  %v2557_v28 = vld [vmem:[%s3928_s2 + $0x2a4] sm:$0xf]  ;;  %v1734_v29 = vor.u32 %v2559_v24, %v1733_v23 }
   0x8   :  { %482 = vmatpush.bf16.msra.mxu0 %v1750_v16  ;;  %v1735_v30 = vld [vmem:[%s3928_s2 + $0x2b0] sm:$0xf0]  ;;  %v2589_v31 = vld [vmem:[%s3928_s2 + $0x3a4] sm:$0xf]  ;;  %v1862_v33 = vor.u32 %v2591_v27, %v1861_v26  ;;  %v1717_v35 = vld [vmem:[%s3928_s2 + $0x280] sm:$0xf] }
   0x9   :  { %v1863_v32 = vld [vmem:[%s3928_s2 + $0x3b0] sm:$0xf0]  ;;  %496 = vmatpush.bf16.msra.mxu1 %v1878_v17  ;;  %510 = vmatpush.bf16.msra.mxu2 %v1754_v21  ;;  %v1738_v34 = vor.u32 %v2557_v28, %v1735_v30  ;;  %v2555_v36 = vld [vmem:[%s3928_s2 + $0x28c] sm:$0xf0]  ;;  %v1845_v37 = vld [vmem:[%s3928_s2 + $0x380] sm:$0xf] }
   0xa   :  { %524 = vmatpush.bf16.msra.mxu3 %v1882_v25  ;;  %v1866_v38 = vor.u32 %v2589_v31, %v1863_v32  ;;  %v2587_v39 = vld [vmem:[%s3928_s2 + $0x38c] sm:$0xf0]  ;;  %v2553_v40 = vld [vmem:[%s3928_s2 + $0x284] sm:$0xf]  ;;  %v1719_v41 = vld [vmem:[%s3928_s2 + $0x290] sm:$0xf0]  ;;  %v1718_v44 = vor.u32 %v2555_v36, %v1717_v35 }
   0xb   :  { %v2585_v42 = vld [vmem:[%s3928_s2 + $0x384] sm:$0xf]  ;;  %v1847_v43 = vld [vmem:[%s3928_s2 + $0x390] sm:$0xf0]  ;;  %v1846_v45 = vor.u32 %v2587_v39, %v1845_v37  ;;  %v1722_v46 = vor.u32 %v2553_v40, %v1719_v41  ;;  %v1701_v47 = vld [vmem:[%s3928_s2 + $0x260] sm:$0xf] }
   0xc   :  { %483 = vmatpush.bf16.msra.mxu0 %v1734_v29  ;;  %v2551_v48 = vld [vmem:[%s3928_s2 + $0x26c] sm:$0xf0]  ;;  %v1829_v49 = vld [vmem:[%s3928_s2 + $0x360] sm:$0xf]  ;;  %v1850_v50 = vor.u32 %v2585_v42, %v1847_v43  ;;  %v2549_v52 = vld [vmem:[%s3928_s2 + $0x264] sm:$0xf] }
   0xd   :  { %497 = vmatpush.bf16.msra.mxu1 %v1862_v33  ;;  %511 = vmatpush.bf16.msra.mxu2 %v1738_v34  ;;  %v2583_v51 = vld [vmem:[%s3928_s2 + $0x36c] sm:$0xf0]  ;;  %v1703_v53 = vld [vmem:[%s3928_s2 + $0x270] sm:$0xf0]  ;;  %v2581_v54 = vld [vmem:[%s3928_s2 + $0x364] sm:$0xf]  ;;  %v1702_v56 = vor.u32 %v2551_v48, %v1701_v47 }
   0xe   :  { %525 = vmatpush.bf16.msra.mxu3 %v1866_v38  ;;  %v1831_v55 = vld [vmem:[%s3928_s2 + $0x370] sm:$0xf0]  ;;  %v1830_v57 = vor.u32 %v2583_v51, %v1829_v49  ;;  %v1706_v58 = vor.u32 %v2549_v52, %v1703_v53  ;;  %v1685_v59 = vld [vmem:[%s3928_s2 + $0x240] sm:$0xf]  ;;  %v2547_v60 = vld [vmem:[%s3928_s2 + $0x24c] sm:$0xf0] }
   0xf   :  { %v1813_v61 = vld [vmem:[%s3928_s2 + $0x340] sm:$0xf]  ;;  %v1834_v62 = vor.u32 %v2581_v54, %v1831_v55  ;;  %v2579_v63 = vld [vmem:[%s3928_s2 + $0x34c] sm:$0xf0]  ;;  %v2545_v0 = vld [vmem:[%s3928_s2 + $0x244] sm:$0xf]  ;;  %v1686_v4 = vor.u32 %v2547_v60, %v1685_v59 }
  0x10   :  { %484 = vmatpush.bf16.msra.mxu0 %v1718_v44  ;;  %v1687_v1 = vld [vmem:[%s3928_s2 + $0x250] sm:$0xf0]  ;;  %v2577_v2 = vld [vmem:[%s3928_s2 + $0x344] sm:$0xf]  ;;  %v1814_v5 = vor.u32 %v2579_v63, %v1813_v61  ;;  %v1669_v7 = vld [vmem:[%s3928_s2 + $0x220] sm:$0xf] }
  0x11   :  { %498 = vmatpush.bf16.msra.mxu1 %v1846_v45  ;;  %512 = vmatpush.bf16.msra.mxu2 %v1722_v46  ;;  %v1815_v3 = vld [vmem:[%s3928_s2 + $0x350] sm:$0xf0]  ;;  %v1690_v6 = vor.u32 %v2545_v0, %v1687_v1  ;;  %v2543_v8 = vld [vmem:[%s3928_s2 + $0x22c] sm:$0xf0]  ;;  %v1797_v9 = vld [vmem:[%s3928_s2 + $0x320] sm:$0xf] }
  0x12   :  { %526 = vmatpush.bf16.msra.mxu3 %v1850_v50  ;;  %v1818_v10 = vor.u32 %v2577_v2, %v1815_v3  ;;  %v2575_v11 = vld [vmem:[%s3928_s2 + $0x32c] sm:$0xf0]  ;;  %v2541_v12 = vld [vmem:[%s3928_s2 + $0x224] sm:$0xf]  ;;  %v1671_v13 = vld [vmem:[%s3928_s2 + $0x230] sm:$0xf0]  ;;  %v1670_v16 = vor.u32 %v2543_v8, %v1669_v7 }
  0x13   :  { %v2573_v14 = vld [vmem:[%s3928_s2 + $0x324] sm:$0xf]  ;;  %v1799_v15 = vld [vmem:[%s3928_s2 + $0x330] sm:$0xf0]  ;;  %v1653_v17 = vld [vmem:[%s3928_s2 + $0x200] sm:$0xf]  ;;  %v1798_v19 = vor.u32 %v2575_v11, %v1797_v9  ;;  %v1674_v20 = vor.u32 %v2541_v12, %v1671_v13 }
  0x14   :  { %485 = vmatpush.bf16.msra.mxu0 %v1702_v56  ;;  %v2539_v18 = vld [vmem:[%s3928_s2 + $0x20c] sm:$0xf0]  ;;  %v1781_v21 = vld [vmem:[%s3928_s2 + $0x300] sm:$0xf]  ;;  %v2537_v23 = vld [vmem:[%s3928_s2 + $0x204] sm:$0xf]  ;;  %v1802_v24 = vor.u32 %v2573_v14, %v1799_v15 }
  0x15   :  { %499 = vmatpush.bf16.msra.mxu1 %v1830_v57  ;;  %513 = vmatpush.bf16.msra.mxu2 %v1706_v58  ;;  %v2571_v22 = vld [vmem:[%s3928_s2 + $0x30c] sm:$0xf0]  ;;  %v1655_v25 = vld [vmem:[%s3928_s2 + $0x210] sm:$0xf0]  ;;  %v2569_v26 = vld [vmem:[%s3928_s2 + $0x304] sm:$0xf]  ;;  %v1654_v31 = vor.u32 %v2539_v18, %v1653_v17 }
  0x16   :  { %527 = vmatpush.bf16.msra.mxu3 %v1834_v62  ;;  %v1783_v27 = vld [vmem:[%s3928_s2 + $0x310] sm:$0xf0]  ;;  %v1773_v28 = vld [vmem:[%s3928_s2 + $0x2e8] sm:$0xf]  ;;  %v2568_v29 = vld [vmem:[%s3928_s2 + $0x2f4] sm:$0xf0]  ;;  %v1782_v35 = vor.u32 %v2571_v22, %v1781_v21  ;;  %v1658_v36 = vor.u32 %v2537_v23, %v1655_v25 }
  0x17   :  { %v1901_v30 = vld [vmem:[%s3928_s2 + $0x3e8] sm:$0xf]  ;;  %v2600_v32 = vld [vmem:[%s3928_s2 + $0x3f4] sm:$0xf0]  ;;  %v2566_v33 = vld [vmem:[%s3928_s2 + $0x2ec] sm:$0xf]  ;;  %v1786_v39 = vor.u32 %v2569_v26, %v1783_v27  ;;  %v1774_v40 = vor.u32 %v2568_v29, %v1773_v28 }
  0x18   :  { %486 = vmatpush.bf16.msra.mxu0 %v1686_v4  ;;  %v1775_v34 = vld [vmem:[%s3928_s2 + $0x2f8] sm:$0xf0]  ;;  %v2598_v37 = vld [vmem:[%s3928_s2 + $0x3ec] sm:$0xf]  ;;  %v1902_v41 = vor.u32 %v2600_v32, %v1901_v30  ;;  %v1757_v43 = vld [vmem:[%s3928_s2 + $0x2c8] sm:$0xf] }
  0x19   :  { %500 = vmatpush.bf16.msra.mxu1 %v1814_v5  ;;  %514 = vmatpush.bf16.msra.mxu2 %v1690_v6  ;;  %v1903_v38 = vld [vmem:[%s3928_s2 + $0x3f8] sm:$0xf0]  ;;  %v1778_v42 = vor.u32 %v2566_v33, %v1775_v34  ;;  %v2564_v44 = vld [vmem:[%s3928_s2 + $0x2d4] sm:$0xf0]  ;;  %v1885_v45 = vld [vmem:[%s3928_s2 + $0x3c8] sm:$0xf] }
  0x1a   :  { %528 = vmatpush.bf16.msra.mxu3 %v1818_v10  ;;  %v1906_v46 = vor.u32 %v2598_v37, %v1903_v38  ;;  %v2596_v47 = vld [vmem:[%s3928_s2 + $0x3d4] sm:$0xf0]  ;;  %v2562_v48 = vld [vmem:[%s3928_s2 + $0x2cc] sm:$0xf]  ;;  %v1759_v49 = vld [vmem:[%s3928_s2 + $0x2d8] sm:$0xf0]  ;;  %v1758_v52 = vor.u32 %v2564_v44, %v1757_v43 }
  0x1b   :  { %v2594_v50 = vld [vmem:[%s3928_s2 + $0x3cc] sm:$0xf]  ;;  %v1887_v51 = vld [vmem:[%s3928_s2 + $0x3d8] sm:$0xf0]  ;;  %v1886_v53 = vor.u32 %v2596_v47, %v1885_v45  ;;  %v1762_v54 = vor.u32 %v2562_v48, %v1759_v49  ;;  %v1741_v55 = vld [vmem:[%s3928_s2 + $0x2a8] sm:$0xf] }
  0x1c   :  { %487 = vmatpush.bf16.msra.mxu0 %v1670_v16  ;;  %v2560_v56 = vld [vmem:[%s3928_s2 + $0x2b4] sm:$0xf0]  ;;  %v1869_v57 = vld [vmem:[%s3928_s2 + $0x3a8] sm:$0xf]  ;;  %v1890_v58 = vor.u32 %v2594_v50, %v1887_v51  ;;  %v2558_v60 = vld [vmem:[%s3928_s2 + $0x2ac] sm:$0xf] }
  0x1d   :  { %501 = vmatpush.bf16.msra.mxu1 %v1798_v19  ;;  %515 = vmatpush.bf16.msra.mxu2 %v1674_v20  ;;  %v2592_v59 = vld [vmem:[%s3928_s2 + $0x3b4] sm:$0xf0]  ;;  %v1743_v61 = vld [vmem:[%s3928_s2 + $0x2b8] sm:$0xf0]  ;;  %v2590_v62 = vld [vmem:[%s3928_s2 + $0x3ac] sm:$0xf]  ;;  %v1742_v1 = vor.u32 %v2560_v56, %v1741_v55 }
  0x1e   :  { %529 = vmatpush.bf16.msra.mxu3 %v1802_v24  ;;  %v1871_v63 = vld [vmem:[%s3928_s2 + $0x3b8] sm:$0xf0]  ;;  %v1725_v0 = vld [vmem:[%s3928_s2 + $0x288] sm:$0xf]  ;;  %v2556_v2 = vld [vmem:[%s3928_s2 + $0x294] sm:$0xf0]  ;;  %v1870_v5 = vor.u32 %v2592_v59, %v1869_v57  ;;  %v1746_v6 = vor.u32 %v2558_v60, %v1743_v61 }
  0x1f   :  { %v1645_v3 = vld [vmem:[%s3929_s0 + $0x10] sm:$0xf]  ;;  %v2536_v4 = vld [vmem:[%s3929_s0 + $0x14] sm:$0xf0]  ;;  %v1853_v7 = vld [vmem:[%s3928_s2 + $0x388] sm:$0xf]  ;;  %v1874_v11 = vor.u32 %v2590_v62, %v1871_v63  ;;  %v1726_v18 = vor.u32 %v2556_v2, %v1725_v0 }
  0x20   :  { %488 = vmatpush.bf16.msra.mxu0 %v1654_v31  ;;  %v2971_v8 = vor.u32 %v2536_v4, %v1645_v3  ;;  %v2535_v9 = vld [vmem:[%s3929_s0 + $0x14] sm:$0xf]  ;;  %v1647_v10 = vld [vmem:[%s3929_s0 + $0x18] sm:$0xf0]  ;;  %v2588_v12 = vld [vmem:[%s3928_s2 + $0x394] sm:$0xf0] }
  0x21   :  { %502 = vmatpush.bf16.msra.mxu1 %v1782_v35  ;;  %516 = vmatpush.bf16.msra.mxu2 %v1658_v36  ;;  %v2554_v13 = vld [vmem:[%s3928_s2 + $0x28c] sm:$0xf]  ;;  %v1727_v14 = vld [vmem:[%s3928_s2 + $0x298] sm:$0xf0]  ;;  %v2988_v15 = vor.u32 %v2535_v9, %v1647_v10  ;;  %v1854_v19 = vor.u32 %v2588_v12, %v1853_v7  ;;  %v1709_v21 = vld [vmem:[%s3928_s2 + $0x268] sm:$0xf] }
  0x22   :  { %530 = vmatpush.bf16.msra.mxu3 %v1786_v39  ;;  %v2586_v16 = vld [vmem:[%s3928_s2 + $0x38c] sm:$0xf]  ;;  %v1855_v17 = vld [vmem:[%s3928_s2 + $0x398] sm:$0xf0]  ;;  %v1730_v20 = vor.u32 %v2554_v13, %v1727_v14  ;;  %v2552_v22 = vld [vmem:[%s3928_s2 + $0x274] sm:$0xf0] }
  0x23   :  { %489 = vmatmul.bf16.vlgmr.msra.gmra.mxu0 %v2971_v8  ;;  %v1837_v23 = vld [vmem:[%s3928_s2 + $0x368] sm:$0xf]  ;;  %v1858_v24 = vor.u32 %v2586_v16, %v1855_v17  ;;  %v2584_v25 = vld [vmem:[%s3928_s2 + $0x374] sm:$0xf0]  ;;  %v2550_v26 = vld [vmem:[%s3928_s2 + $0x26c] sm:$0xf]  ;;  %v1710_v30 = vor.u32 %v2552_v22, %v1709_v21 }
  0x24   :  { %537 = vmatpush.bf16.msrb.mxu0 %v1774_v40  ;;  %517 = vmatmul.bf16.vlgmr.msra.gmra.mxu2 %v2971_v8  ;;  %v1711_v27 = vld [vmem:[%s3928_s2 + $0x278] sm:$0xf0]  ;;  %v2582_v28 = vld [vmem:[%s3928_s2 + $0x36c] sm:$0xf]  ;;  %v1838_v31 = vor.u32 %v2584_v25, %v1837_v23  ;;  %v1693_v33 = vld [vmem:[%s3928_s2 + $0x248] sm:$0xf] }
  0x25   :  { %551 = vmatpush.bf16.msrb.mxu1 %v1902_v41  ;;  %565 = vmatpush.bf16.msrb.mxu2 %v1778_v42  ;;  %v1839_v29 = vld [vmem:[%s3928_s2 + $0x378] sm:$0xf0]  ;;  %v1714_v32 = vor.u32 %v2550_v26, %v1711_v27  ;;  %v2548_v34 = vld [vmem:[%s3928_s2 + $0x254] sm:$0xf0]  ;;  %v1821_v35 = vld [vmem:[%s3928_s2 + $0x348] sm:$0xf] }
  0x26   :  { %579 = vmatpush.bf16.msrb.mxu3 %v1906_v46  ;;  %503 = vmatmul.bf16.vlgmr.msra.gmra.mxu1 %v2988_v15  ;;  %v1842_v36 = vor.u32 %v2582_v28, %v1839_v29  ;;  %v2580_v37 = vld [vmem:[%s3928_s2 + $0x354] sm:$0xf0]  ;;  %v2546_v38 = vld [vmem:[%s3928_s2 + $0x24c] sm:$0xf]  ;;  %v1695_v39 = vld [vmem:[%s3928_s2 + $0x258] sm:$0xf0]  ;;  %v1694_v42 = vor.u32 %v2548_v34, %v1693_v33 }
  0x27   :  { %531 = vmatmul.bf16.vlgmr.msra.gmra.mxu3 %v2988_v15  ;;  %v2578_v40 = vld [vmem:[%s3928_s2 + $0x34c] sm:$0xf]  ;;  %v1823_v41 = vld [vmem:[%s3928_s2 + $0x358] sm:$0xf0]  ;;  %v1822_v43 = vor.u32 %v2580_v37, %v1821_v35  ;;  %v1698_v44 = vor.u32 %v2546_v38, %v1695_v39  ;;  %v1677_v45 = vld [vmem:[%s3928_s2 + $0x228] sm:$0xf] }
  0x28   :  { %538 = vmatpush.bf16.msrb.mxu0 %v1758_v52  ;;  %v2544_v46 = vld [vmem:[%s3928_s2 + $0x234] sm:$0xf0]  ;;  %v1805_v47 = vld [vmem:[%s3928_s2 + $0x328] sm:$0xf]  ;;  %v1826_v48 = vor.u32 %v2578_v40, %v1823_v41  ;;  %v2542_v50 = vld [vmem:[%s3928_s2 + $0x22c] sm:$0xf] }
  0x29   :  { %552 = vmatpush.bf16.msrb.mxu1 %v1886_v53  ;;  %566 = vmatpush.bf16.msrb.mxu2 %v1762_v54  ;;  %v2576_v49 = vld [vmem:[%s3928_s2 + $0x334] sm:$0xf0]  ;;  %v1679_v51 = vld [vmem:[%s3928_s2 + $0x238] sm:$0xf0]  ;;  %v2574_v52 = vld [vmem:[%s3928_s2 + $0x32c] sm:$0xf]  ;;  %v1678_v54 = vor.u32 %v2544_v46, %v1677_v45 }
  0x2a   :  { %580 = vmatpush.bf16.msrb.mxu3 %v1890_v58  ;;  %v1807_v53 = vld [vmem:[%s3928_s2 + $0x338] sm:$0xf0]  ;;  %v1661_v55 = vld [vmem:[%s3928_s2 + $0x208] sm:$0xf]  ;;  %v2540_v56 = vld [vmem:[%s3928_s2 + $0x214] sm:$0xf0]  ;;  %v1806_v57 = vor.u32 %v2576_v49, %v1805_v47  ;;  %v1682_v58 = vor.u32 %v2542_v50, %v1679_v51 }
  0x2b   :  { %v1789_v59 = vld [vmem:[%s3928_s2 + $0x308] sm:$0xf]  ;;  %v2572_v60 = vld [vmem:[%s3928_s2 + $0x314] sm:$0xf0]  ;;  %v2538_v61 = vld [vmem:[%s3928_s2 + $0x20c] sm:$0xf]  ;;  %v1810_v62 = vor.u32 %v2574_v52, %v1807_v53 }
  0x2c   :  { %539 = vmatpush.bf16.msrb.mxu0 %v1742_v1  ;;  %v1663_v63 = vld [vmem:[%s3928_s2 + $0x218] sm:$0xf0]  ;;  %v2570_v0 = vld [vmem:[%s3928_s2 + $0x30c] sm:$0xf]  ;;  %v2029_v2 = vld [vmem:[%s3928_s2 + $0xe0] sm:$0xf]  ;;  %v1790_v10 = vor.u32 %v2572_v60, %v1789_v59 }
  0x2d   :  { %553 = vmatpush.bf16.msrb.mxu1 %v1870_v5  ;;  %567 = vmatpush.bf16.msrb.mxu2 %v1746_v6  ;;  %v1791_v1 = vld [vmem:[%s3928_s2 + $0x318] sm:$0xf0]  ;;  %v2501_v3 = vld [vmem:[%s3928_s2 + $0xec] sm:$0xf0]  ;;  %v2157_v4 = vld [vmem:[%s3928_s2 + $0x1e0] sm:$0xf]  ;;  %v1662_v5 = vor.u32 %v2540_v56, %v1661_v55 }
  0x2e   :  { %581 = vmatpush.bf16.msrb.mxu3 %v1874_v11  ;;  %v2533_v6 = vld [vmem:[%s3928_s2 + $0x1ec] sm:$0xf0]  ;;  %v2499_v7 = vld [vmem:[%s3928_s2 + $0xe4] sm:$0xf]  ;;  %v2031_v9 = vld [vmem:[%s3928_s2 + $0xf0] sm:$0xf0]  ;;  %v1666_v11 = vor.u32 %v2538_v61, %v1663_v63  ;;  %v1794_v14 = vor.u32 %v2570_v0, %v1791_v1  ;;  %v2030_v16 = vor.u32 %v2501_v3, %v2029_v2 }
  0x2f   :  { %v2531_v12 = vld [vmem:[%s3928_s2 + $0x1e4] sm:$0xf]  ;;  %v2159_v13 = vld [vmem:[%s3928_s2 + $0x1f0] sm:$0xf0]  ;;  %v2158_v17 = vor.u32 %v2533_v6, %v2157_v4  ;;  %v2141_v21 = vld [vmem:[%s3928_s2 + $0x1c0] sm:$0xf] }
  0x30   :  { %540 = vmatpush.bf16.msrb.mxu0 %v1726_v18  ;;  %v2034_v18 = vor.u32 %v2499_v7, %v2031_v9  ;;  %v2162_v22 = vor.u32 %v2531_v12, %v2159_v13  ;;  %v2529_v23 = vld [vmem:[%s3928_s2 + $0x1cc] sm:$0xf0]  ;;  %v2015_v25 = vld [vmem:[%s3928_s2 + $0xd0] sm:$0xf0]  ;;  %v2527_v26 = vld [vmem:[%s3928_s2 + $0x1c4] sm:$0xf] }
  0x31   :  { %554 = vmatpush.bf16.msrb.mxu1 %v1854_v19  ;;  %568 = vmatpush.bf16.msrb.mxu2 %v1730_v20  ;;  %v2013_v19 = vld [vmem:[%s3928_s2 + $0xc0] sm:$0xf]  ;;  %v2497_v20 = vld [vmem:[%s3928_s2 + $0xcc] sm:$0xf0]  ;;  %v2143_v27 = vld [vmem:[%s3928_s2 + $0x1d0] sm:$0xf0]  ;;  %v2142_v29 = vor.u32 %v2529_v23, %v2141_v21 }
  0x32   :  { %582 = vmatpush.bf16.msrb.mxu3 %v1858_v24  ;;  %v2495_v24 = vld [vmem:[%s3928_s2 + $0xc4] sm:$0xf]  ;;  %v2014_v28 = vor.u32 %v2497_v20, %v2013_v19  ;;  %v2125_v33 = vld [vmem:[%s3928_s2 + $0x1a0] sm:$0xf]  ;;  %v2146_v34 = vor.u32 %v2527_v26, %v2143_v27  ;;  %v2525_v35 = vld [vmem:[%s3928_s2 + $0x1ac] sm:$0xf0] }
  0x33   :  { %v1999_v37 = vld [vmem:[%s3928_s2 + $0xb0] sm:$0xf0]  ;;  %v2523_v38 = vld [vmem:[%s3928_s2 + $0x1a4] sm:$0xf]  ;;  %v2126_v41 = vor.u32 %v2525_v35, %v2125_v33  ;;  %v1965_v53 = vld [vmem:[%s3928_s2 + $0x60] sm:$0xf] }
  0x34   :  { %541 = vmatpush.bf16.msrb.mxu0 %v1710_v30  ;;  %v2018_v30 = vor.u32 %v2495_v24, %v2015_v25  ;;  %v2127_v39 = vld [vmem:[%s3928_s2 + $0x1b0] sm:$0xf0]  ;;  %v2487_v46 = vld [vmem:[%s3928_s2 + $0x84] sm:$0xf]  ;;  %v2093_v55 = vld [vmem:[%s3928_s2 + $0x160] sm:$0xf] }
  0x35   :  { %555 = vmatpush.bf16.msrb.mxu1 %v1838_v31  ;;  %569 = vmatpush.bf16.msrb.mxu2 %v1714_v32  ;;  %v1997_v31 = vld [vmem:[%s3928_s2 + $0xa0] sm:$0xf]  ;;  %v2493_v32 = vld [vmem:[%s3928_s2 + $0xac] sm:$0xf0]  ;;  %v2130_v45 = vor.u32 %v2523_v38, %v2127_v39  ;;  %v1983_v47 = vld [vmem:[%s3928_s2 + $0x90] sm:$0xf0] }
  0x36   :  { %583 = vmatpush.bf16.msrb.mxu3 %v1842_v36  ;;  %v2491_v36 = vld [vmem:[%s3928_s2 + $0xa4] sm:$0xf]  ;;  %v1998_v40 = vor.u32 %v2493_v32, %v1997_v31  ;;  %v2111_v49 = vld [vmem:[%s3928_s2 + $0x190] sm:$0xf0]  ;;  %v1986_v52 = vor.u32 %v2487_v46, %v1983_v47  ;;  %v1949_v1 = vld [vmem:[%s3928_s2 + $0x40] sm:$0xf] }
  0x37   :  { %v1967_v59 = vld [vmem:[%s3928_s2 + $0x70] sm:$0xf0]  ;;  %v2515_v60 = vld [vmem:[%s3928_s2 + $0x164] sm:$0xf]  ;;  %v2481_v2 = vld [vmem:[%s3928_s2 + $0x4c] sm:$0xf0] }
  0x38   :  { %542 = vmatpush.bf16.msrb.mxu0 %v1694_v42  ;;  %v2002_v42 = vor.u32 %v2491_v36, %v1999_v37  ;;  %v2095_v61 = vld [vmem:[%s3928_s2 + $0x170] sm:$0xf0]  ;;  %v2077_v3 = vld [vmem:[%s3928_s2 + $0x140] sm:$0xf]  ;;  %v2479_v6 = vld [vmem:[%s3928_s2 + $0x44] sm:$0xf] }
  0x39   :  { %556 = vmatpush.bf16.msrb.mxu1 %v1822_v43  ;;  %570 = vmatpush.bf16.msrb.mxu2 %v1698_v44  ;;  %v1981_v43 = vld [vmem:[%s3928_s2 + $0x80] sm:$0xf]  ;;  %v2489_v44 = vld [vmem:[%s3928_s2 + $0x8c] sm:$0xf0]  ;;  %v2098_v4 = vor.u32 %v2515_v60, %v2095_v61  ;;  %v1951_v7 = vld [vmem:[%s3928_s2 + $0x50] sm:$0xf0] }
  0x3a   :  { %584 = vmatpush.bf16.msrb.mxu3 %v1826_v48  ;;  %v2519_v48 = vld [vmem:[%s3928_s2 + $0x184] sm:$0xf]  ;;  %v1982_v50 = vor.u32 %v2489_v44, %v1981_v43  ;;  %v1954_v13 = vor.u32 %v2479_v6, %v1951_v7  ;;  %v2509_v19 = vld [vmem:[%s3928_s2 + $0x12c] sm:$0xf0]  ;;  %v1935_v21 = vld [vmem:[%s3928_s2 + $0x30] sm:$0xf0] }
  0x3b   :  { %v2114_v56 = vor.u32 %v2519_v48, %v2111_v49  ;;  %v2511_v9 = vld [vmem:[%s3928_s2 + $0x144] sm:$0xf]  ;;  %v2063_v23 = vld [vmem:[%s3928_s2 + $0x130] sm:$0xf0]  ;;  %v1917_v25 = vld [vmem:[%s3928_s2] sm:$0xf] }
  0x3c   :  { %543 = vmatpush.bf16.msrb.mxu0 %v1678_v54  ;;  %v2485_v54 = vld [vmem:[%s3928_s2 + $0x6c] sm:$0xf0]  ;;  %v2475_v20 = vld [vmem:[%s3928_s2 + $0x24] sm:$0xf]  ;;  %v2045_v27 = vld [vmem:[%s3928_s2 + $0x100] sm:$0xf] }
  0x3d   :  { %557 = vmatpush.bf16.msrb.mxu1 %v1806_v57  ;;  %571 = vmatpush.bf16.msrb.mxu2 %v1682_v58  ;;  %v2517_v57 = vld [vmem:[%s3928_s2 + $0x16c] sm:$0xf0]  ;;  %v2483_v58 = vld [vmem:[%s3928_s2 + $0x64] sm:$0xf]  ;;  %v1919_v32 = vld [vmem:[%s3928_s2 + $0x10] sm:$0xf0] }
  0x3e   :  { %585 = vmatpush.bf16.msrb.mxu3 %v1810_v62  ;;  %v1966_v62 = vor.u32 %v2485_v54, %v1965_v53  ;;  %v2094_v63 = vor.u32 %v2517_v57, %v2093_v55  ;;  %v1970_v0 = vor.u32 %v2483_v58, %v1967_v59  ;;  %v2473_v26 = vld [vmem:[%s3928_s2 + $0xc] sm:$0xf0]  ;;  %v2471_v31 = vld [vmem:[%s3928_s2 + $0x4] sm:$0xf]  ;;  %v2047_v35 = vld [vmem:[%s3928_s2 + $0x110] sm:$0xf0] }
  0x3f   :  { %v2037_v36 = vld [vmem:[%s3928_s2 + $0xe8] sm:$0xf]  ;;  %v2502_v37 = vld [vmem:[%s3928_s2 + $0xf4] sm:$0xf0]  ;;  %v2532_v43 = vld [vmem:[%s3928_s2 + $0x1ec] sm:$0xf] }
  0x40   :  { %544 = vmatpush.bf16.msrb.mxu0 %v1662_v5  ;;  %v2513_v5 = vld [vmem:[%s3928_s2 + $0x14c] sm:$0xf0]  ;;  %v2165_v38 = vld [vmem:[%s3928_s2 + $0x1e8] sm:$0xf]  ;;  %v2534_v39 = vld [vmem:[%s3928_s2 + $0x1f4] sm:$0xf0]  ;;  %v2038_v48 = vor.u32 %v2502_v37, %v2037_v36 }
  0x41   :  { %558 = vmatpush.bf16.msrb.mxu1 %v1790_v10  ;;  %572 = vmatpush.bf16.msrb.mxu2 %v1666_v11  ;;  %v2079_v10 = vld [vmem:[%s3928_s2 + $0x150] sm:$0xf0]  ;;  %v1950_v11 = vor.u32 %v2481_v2, %v1949_v1  ;;  %v2078_v12 = vor.u32 %v2513_v5, %v2077_v3  ;;  %v2470_v46 = vld [vmem:[%s3929_s0 + $0x4] sm:$0xf0]  ;;  %v2469_v49 = vld [vmem:[%s3929_s0 + $0x4] sm:$0xf] }
  0x42   :  { %586 = vmatpush.bf16.msrb.mxu3 %v1794_v14  ;;  %v1933_v14 = vld [vmem:[%s3928_s2 + $0x20] sm:$0xf]  ;;  %v2021_v53 = vld [vmem:[%s3928_s2 + $0xc8] sm:$0xf]  ;;  %v2498_v54 = vld [vmem:[%s3928_s2 + $0xd4] sm:$0xf0] }
  0x43   :  { %545 = vmatmul.bf16.vlgmr.msrb.gmra.mxu0 %v2971_v8  ;;  %v2149_v55 = vld [vmem:[%s3928_s2 + $0x1c8] sm:$0xf]  ;;  %v2530_v58 = vld [vmem:[%s3928_s2 + $0x1d4] sm:$0xf0]  ;;  %v2496_v59 = vld [vmem:[%s3928_s2 + $0xcc] sm:$0xf] }
  0x44   :  { %923 = vmatpush.bf16.msra.mxu0 %v2030_v16  ;;  %573 = vmatmul.bf16.vlgmr.msrb.gmra.mxu2 %v2971_v8  ;;  %v2109_v8 = vld [vmem:[%s3928_s2 + $0x180] sm:$0xf]  ;;  %v2477_v16 = vld [vmem:[%s3928_s2 + $0x2c] sm:$0xf0]  ;;  %v2023_v60 = vld [vmem:[%s3928_s2 + $0xd8] sm:$0xf0]  ;;  %v2150_v1 = vor.u32 %v2530_v58, %v2149_v55 }
  0x45   :  { %937 = vmatpush.bf16.msra.mxu1 %v2158_v17  ;;  %951 = vmatpush.bf16.msra.mxu2 %v2034_v18  ;;  %v2061_v17 = vld [vmem:[%s3928_s2 + $0x120] sm:$0xf]  ;;  %v2082_v18 = vor.u32 %v2511_v9, %v2079_v10  ;;  %v1934_v24 = vor.u32 %v2477_v16, %v1933_v14  ;;  %v2026_v2 = vor.u32 %v2496_v59, %v2023_v60  ;;  %v2005_v3 = vld [vmem:[%s3928_s2 + $0xa8] sm:$0xf]  ;;  %v2526_v7 = vld [vmem:[%s3928_s2 + $0x1b4] sm:$0xf0] }
  0x46   :  { %965 = vmatpush.bf16.msra.mxu3 %v2162_v22  ;;  %559 = vmatmul.bf16.vlgmr.msrb.gmra.mxu1 %v2988_v15  ;;  %v2507_v22 = vld [vmem:[%s3928_s2 + $0x124] sm:$0xf]  ;;  %v2133_v5 = vld [vmem:[%s3928_s2 + $0x1a8] sm:$0xf]  ;;  %v2492_v9 = vld [vmem:[%s3928_s2 + $0xac] sm:$0xf] }
  0x47   :  { %587 = vmatmul.bf16.vlgmr.msrb.gmra.mxu3 %v2988_v15  ;;  %v2521_v15 = vld [vmem:[%s3928_s2 + $0x18c] sm:$0xf0]  ;;  %v2066_v33 = vor.u32 %v2507_v22, %v2063_v23  ;;  %v2007_v10 = vld [vmem:[%s3928_s2 + $0xb8] sm:$0xf0]  ;;  %v2134_v14 = vor.u32 %v2526_v7, %v2133_v5  ;;  %v2488_v22 = vld [vmem:[%s3928_s2 + $0x8c] sm:$0xf] }
  0x48   :  { %924 = vmatpush.bf16.msra.mxu0 %v2014_v28  ;;  %v2110_v51 = vor.u32 %v2521_v15, %v2109_v8  ;;  %v2062_v28 = vor.u32 %v2509_v19, %v2061_v17  ;;  %v1922_v8 = vor.u32 %v2471_v31, %v1919_v32  ;;  %v1909_v15 = vld [vmem:[%s3929_s0] sm:$0xf]  ;;  %v2010_v16 = vor.u32 %v2492_v9, %v2007_v10  ;;  %v1989_v17 = vld [vmem:[%s3928_s2 + $0x88] sm:$0xf]  ;;  %v1991_v23 = vld [vmem:[%s3928_s2 + $0x98] sm:$0xf0] }
  0x49   :  { %938 = vmatpush.bf16.msra.mxu1 %v2142_v29  ;;  %952 = vmatpush.bf16.msra.mxu2 %v2018_v30  ;;  %v1938_v29 = vor.u32 %v2475_v20, %v1935_v21  ;;  %v2505_v30 = vld [vmem:[%s3928_s2 + $0x10c] sm:$0xf0]  ;;  %v3337_v57 = vor.u32 %v2470_v46, %v1909_v15  ;;  %v2117_v19 = vld [vmem:[%s3928_s2 + $0x188] sm:$0xf]  ;;  %v2522_v21 = vld [vmem:[%s3928_s2 + $0x194] sm:$0xf0] }
  0x4a   :  { %966 = vmatpush.bf16.msra.mxu3 %v2146_v34  ;;  %v2503_v34 = vld [vmem:[%s3928_s2 + $0x104] sm:$0xf]  ;;  %v2046_v44 = vor.u32 %v2505_v30, %v2045_v27  ;;  %v2118_v27 = vor.u32 %v2522_v21, %v2117_v19  ;;  %v2486_v30 = vld [vmem:[%s3928_s2 + $0x74] sm:$0xf0]  ;;  %v2101_v31 = vld [vmem:[%s3928_s2 + $0x168] sm:$0xf] }
  0x4b   :  { %v2050_v47 = vor.u32 %v2503_v34, %v2047_v35  ;;  %v2484_v34 = vld [vmem:[%s3928_s2 + $0x6c] sm:$0xf]  ;;  %v1975_v35 = vld [vmem:[%s3928_s2 + $0x78] sm:$0xf0]  ;;  %v2510_v55 = vld [vmem:[%s3928_s2 + $0x134] sm:$0xf0] }
  0x4c   :  { %925 = vmatpush.bf16.msra.mxu0 %v1998_v40  ;;  %v1918_v40 = vor.u32 %v2473_v26, %v1917_v25  ;;  %v2119_v25 = vld [vmem:[%s3928_s2 + $0x198] sm:$0xf0]  ;;  %v2516_v36 = vld [vmem:[%s3928_s2 + $0x16c] sm:$0xf] }
  0x4d   :  { %939 = vmatpush.bf16.msra.mxu1 %v2126_v41  ;;  %953 = vmatpush.bf16.msra.mxu2 %v2002_v42  ;;  %v2500_v41 = vld [vmem:[%s3928_s2 + $0xec] sm:$0xf]  ;;  %v2039_v42 = vld [vmem:[%s3928_s2 + $0xf8] sm:$0xf0] }
  0x4e   :  { %967 = vmatpush.bf16.msra.mxu3 %v2130_v45  ;;  %v2167_v45 = vld [vmem:[%s3928_s2 + $0x1f8] sm:$0xf0]  ;;  %v2512_v46 = vld [vmem:[%s3928_s2 + $0x14c] sm:$0xf] }
  0x4f   :  { %v2103_v37 = vld [vmem:[%s3928_s2 + $0x178] sm:$0xf0]  ;;  %v2508_v59 = vld [vmem:[%s3928_s2 + $0x12c] sm:$0xf] }
  0x50   :  { %926 = vmatpush.bf16.msra.mxu0 %v1982_v50  ;;  %v1911_v50 = vld [vmem:[%s3929_s0 + $0x8] sm:$0xf0]  ;;  %v1959_v15 = vld [vmem:[%s3928_s2 + $0x58] sm:$0xf0] }
  0x51   :  { %940 = vmatpush.bf16.msra.mxu1 %v2110_v51  ;;  %954 = vmatpush.bf16.msra.mxu2 %v1986_v52  ;;  %v2166_v51 = vor.u32 %v2534_v39, %v2165_v38  ;;  %v2042_v52 = vor.u32 %v2500_v41, %v2039_v42  ;;  %v3348_v61 = vor.u32 %v2469_v49, %v1911_v50  ;;  %v1957_v41 = vld [vmem:[%s3928_s2 + $0x48] sm:$0xf]  ;;  %v2482_v42 = vld [vmem:[%s3928_s2 + $0x54] sm:$0xf0]  ;;  %v1943_v58 = vld [vmem:[%s3928_s2 + $0x38] sm:$0xf0] }
  0x52   :  { %968 = vmatpush.bf16.msra.mxu3 %v2114_v56  ;;  %v2170_v56 = vor.u32 %v2532_v43, %v2167_v45  ;;  %v2085_v43 = vld [vmem:[%s3928_s2 + $0x148] sm:$0xf]  ;;  %v2480_v45 = vld [vmem:[%s3928_s2 + $0x4c] sm:$0xf]  ;;  %v2071_v60 = vld [vmem:[%s3928_s2 + $0x138] sm:$0xf0] }
  0x53   :  { %v1962_v50 = vor.u32 %v2480_v45, %v1959_v15  ;;  %v2472_v5 = vld [vmem:[%s3928_s2 + $0xc] sm:$0xf]  ;;  %v1927_v7 = vld [vmem:[%s3928_s2 + $0x18] sm:$0xf0] }
  0x54   :  { %927 = vmatpush.bf16.msra.mxu0 %v1966_v62  ;;  %v2528_v62 = vld [vmem:[%s3928_s2 + $0x1cc] sm:$0xf]  ;;  %v2055_v10 = vld [vmem:[%s3928_s2 + $0x118] sm:$0xf0] }
  0x55   :  { %941 = vmatpush.bf16.msra.mxu1 %v2094_v63  ;;  %955 = vmatpush.bf16.msra.mxu2 %v1970_v0  ;;  %v2151_v63 = vld [vmem:[%s3928_s2 + $0x1d8] sm:$0xf0]  ;;  %v2022_v0 = vor.u32 %v2498_v54, %v2021_v53  ;;  %v2069_v53 = vld [vmem:[%s3928_s2 + $0x128] sm:$0xf]  ;;  %v2504_v9 = vld [vmem:[%s3928_s2 + $0x10c] sm:$0xf] }
  0x56   :  { %969 = vmatpush.bf16.msra.mxu3 %v2098_v4  ;;  %v2494_v4 = vld [vmem:[%s3928_s2 + $0xb4] sm:$0xf0]  ;;  %v2154_v6 = vor.u32 %v2528_v62, %v2151_v63  ;;  %v1925_v63 = vld [vmem:[%s3928_s2 + $0x8] sm:$0xf]  ;;  %v2631_v21 = vld [vmem:[%s3930_s3 + $0xec] sm:$0xf] }
  0x57   :  { %v2623_v45 = vld [vmem:[%s3930_s3 + $0xac] sm:$0xf]  ;;  %v2267_v15 = vld [vmem:[%s3930_s3 + $0xb8] sm:$0xf0] }
  0x58   :  { %928 = vmatpush.bf16.msra.mxu0 %v1950_v11  ;;  %v2524_v11 = vld [vmem:[%s3928_s2 + $0x1ac] sm:$0xf] }
  0x59   :  { %942 = vmatpush.bf16.msra.mxu1 %v2078_v12  ;;  %956 = vmatpush.bf16.msra.mxu2 %v1954_v13  ;;  %v2135_v12 = vld [vmem:[%s3928_s2 + $0x1b8] sm:$0xf0]  ;;  %v2006_v13 = vor.u32 %v2494_v4, %v2005_v3  ;;  %v2053_v3 = vld [vmem:[%s3928_s2 + $0x108] sm:$0xf]  ;;  %v2506_v4 = vld [vmem:[%s3928_s2 + $0x114] sm:$0xf0] }
  0x5a   :  { %970 = vmatpush.bf16.msra.mxu3 %v2082_v18  ;;  %v2490_v18 = vld [vmem:[%s3928_s2 + $0x94] sm:$0xf0]  ;;  %v2138_v20 = vor.u32 %v2524_v11, %v2135_v12  ;;  %v2289_v11 = vld [vmem:[%s3930_s3 + $0xe0] sm:$0xf]  ;;  %v2632_v12 = vld [vmem:[%s3930_s3 + $0xec] sm:$0xf0]  ;;  %v2054_v19 = vor.u32 %v2506_v4, %v2053_v3 }
  0x5b   :  { %v1990_v26 = vor.u32 %v2490_v18, %v1989_v17  ;;  %v2297_v17 = vld [vmem:[%s3930_s3 + $0xe8] sm:$0xf]  ;;  %v2633_v18 = vld [vmem:[%s3930_s3 + $0xf4] sm:$0xf0]  ;;  %v2615_v4 = vld [vmem:[%s3930_s3 + $0x6c] sm:$0xf] }
  0x5c   :  { %929 = vmatpush.bf16.msra.mxu0 %v1934_v24  ;;  %v2520_v24 = vld [vmem:[%s3928_s2 + $0x18c] sm:$0xf]  ;;  %v2617_v3 = vld [vmem:[%s3930_s3 + $0x74] sm:$0xf0] }
  0x5d   :  { %943 = vmatpush.bf16.msra.mxu1 %v2062_v28  ;;  %957 = vmatpush.bf16.msra.mxu2 %v1938_v29  ;;  %v1994_v28 = vor.u32 %v2488_v22, %v1991_v23  ;;  %v1973_v29 = vld [vmem:[%s3928_s2 + $0x68] sm:$0xf]  ;;  %v2122_v32 = vor.u32 %v2520_v24, %v2119_v25  ;;  %v2299_v22 = vld [vmem:[%s3930_s3 + $0xf8] sm:$0xf0]  ;;  %v2058_v23 = vor.u32 %v2504_v9, %v2055_v10  ;;  %v2209_v10 = vld [vmem:[%s3930_s3 + $0x40] sm:$0xf] }
  0x5e   :  { %971 = vmatpush.bf16.msra.mxu3 %v2066_v33  ;;  %v2518_v33 = vld [vmem:[%s3928_s2 + $0x174] sm:$0xf0]  ;;  %v1974_v38 = vor.u32 %v2486_v30, %v1973_v29  ;;  %v2290_v24 = vor.u32 %v2632_v12, %v2289_v11  ;;  %v2626_v29 = vld [vmem:[%s3930_s3 + $0xc4] sm:$0xf]  ;;  %v2302_v30 = vor.u32 %v2631_v21, %v2299_v22  ;;  %v2612_v11 = vld [vmem:[%s3930_s3 + $0x4c] sm:$0xf0] }
  0x5f   :  { %v2102_v39 = vor.u32 %v2518_v33, %v2101_v31  ;;  %v2275_v31 = vld [vmem:[%s3930_s3 + $0xd0] sm:$0xf0]  ;;  %v2629_v33 = vld [vmem:[%s3930_s3 + $0xd4] sm:$0xf0]  ;;  %v2610_v12 = vld [vmem:[%s3930_s3 + $0x44] sm:$0xf] }
  0x60   :  { %930 = vmatpush.bf16.msra.mxu0 %v1918_v40  ;;  %v1978_v40 = vor.u32 %v2484_v34, %v1975_v35  ;;  %v2627_v34 = vld [vmem:[%s3930_s3 + $0xcc] sm:$0xf]  ;;  %v2283_v35 = vld [vmem:[%s3930_s3 + $0xd8] sm:$0xf0] }
  0x61   :  { %944 = vmatpush.bf16.msra.mxu1 %v2046_v44  ;;  %958 = vmatpush.bf16.msra.mxu2 %v1922_v8  ;;  %v2106_v44 = vor.u32 %v2516_v36, %v2103_v37  ;;  %v2514_v8 = vld [vmem:[%s3928_s2 + $0x154] sm:$0xf0]  ;;  %v2278_v37 = vor.u32 %v2626_v29, %v2275_v31  ;;  %v2203_v31 = vld [vmem:[%s3930_s3 + $0x38] sm:$0xf0] }
  0x62   :  { %972 = vmatpush.bf16.msra.mxu3 %v2050_v47  ;;  %v2087_v47 = vld [vmem:[%s3928_s2 + $0x158] sm:$0xf0]  ;;  %v2086_v49 = vor.u32 %v2514_v8, %v2085_v43  ;;  %v2259_v43 = vld [vmem:[%s3930_s3 + $0xb0] sm:$0xf0]  ;;  %v2625_v8 = vld [vmem:[%s3930_s3 + $0xb4] sm:$0xf0] }
  0x63   :  { %931 = vmatmul.bf16.vlgmr.msra.gmra.mxu0 %v3337_v57  ;;  %v2090_v54 = vor.u32 %v2512_v46, %v2087_v47  ;;  %v2609_v29 = vld [vmem:[%s3930_s3 + $0x34] sm:$0xf0] }
  0x64   :  { %979 = vmatpush.bf16.msrb.mxu0 %v2038_v48  ;;  %959 = vmatmul.bf16.vlgmr.msra.gmra.mxu2 %v3337_v57  ;;  %v1958_v48 = vor.u32 %v2482_v42, %v1957_v41  ;;  %v2622_v41 = vld [vmem:[%s3930_s3 + $0xa4] sm:$0xf]  ;;  %v2286_v42 = vor.u32 %v2627_v34, %v2283_v35  ;;  %v2604_v34 = vld [vmem:[%s3930_s3 + $0xc] sm:$0xf0] }
  0x65   :  { %993 = vmatpush.bf16.msrb.mxu1 %v2166_v51  ;;  %1007 = vmatpush.bf16.msrb.mxu2 %v2042_v52  ;;  %v1941_v51 = vld [vmem:[%s3928_s2 + $0x28] sm:$0xf]  ;;  %v2478_v52 = vld [vmem:[%s3928_s2 + $0x34] sm:$0xf0]  ;;  %v2262_v47 = vor.u32 %v2622_v41, %v2259_v43  ;;  %v2187_v43 = vld [vmem:[%s3930_s3 + $0x18] sm:$0xf0] }
  0x66   :  { %1021 = vmatpush.bf16.msrb.mxu3 %v2170_v56  ;;  %945 = vmatmul.bf16.vlgmr.msra.gmra.mxu1 %v3348_v61  ;;  %v2476_v56 = vld [vmem:[%s3928_s2 + $0x2c] sm:$0xf]  ;;  %v1942_v62 = vor.u32 %v2478_v52, %v1941_v51  ;;  %v2243_v51 = vld [vmem:[%s3930_s3 + $0x90] sm:$0xf0]  ;;  %v2249_v52 = vld [vmem:[%s3930_s3 + $0x88] sm:$0xf] }
  0x67   :  { %973 = vmatmul.bf16.vlgmr.msra.gmra.mxu3 %v3348_v61  ;;  %v2605_v41 = vld [vmem:[%s3930_s3 + $0x14] sm:$0xf0] }
  0x68   :  { %980 = vmatpush.bf16.msrb.mxu0 %v2022_v0  ;;  %v2474_v0 = vld [vmem:[%s3928_s2 + $0x14] sm:$0xf0] }
  0x69   :  { %994 = vmatpush.bf16.msrb.mxu1 %v2150_v1  ;;  %1008 = vmatpush.bf16.msrb.mxu2 %v2026_v2  ;;  %v2070_v1 = vor.u32 %v2510_v55, %v2069_v53  ;;  %v1946_v2 = vor.u32 %v2476_v56, %v1943_v58  ;;  %v2621_v53 = vld [vmem:[%s3930_s3 + $0x94] sm:$0xf0]  ;;  %v2251_v55 = vld [vmem:[%s3930_s3 + $0x98] sm:$0xf0] }
  0x6a   :  { %1022 = vmatpush.bf16.msrb.mxu3 %v2154_v6  ;;  %v2074_v6 = vor.u32 %v2508_v59, %v2071_v60  ;;  %v2250_v59 = vor.u32 %v2621_v53, %v2249_v52  ;;  %v2225_v60 = vld [vmem:[%s3930_s3 + $0x60] sm:$0xf] }
  0x6b   :  { %v2601_v53 = vld [vmem:[%s3931_s1] sm:$0xff] }
  0x6c   :  { %981 = vmatpush.bf16.msrb.mxu0 %v2006_v13  ;;  %v2630_v13 = vld [vmem:[%s3930_s3 + $0xe4] sm:$0xf] }
  0x6d   :  { %995 = vmatpush.bf16.msrb.mxu1 %v2134_v14  ;;  %1009 = vmatpush.bf16.msrb.mxu2 %v2010_v16  ;;  %v1926_v14 = vor.u32 %v2474_v0, %v1925_v63  ;;  %v2291_v16 = vld [vmem:[%s3930_s3 + $0xf0] sm:$0xf0]  ;;  %v2614_v63 = vld [vmem:[%s3930_s3 + $0x64] sm:$0xf] }
  0x6e   :  { %1023 = vmatpush.bf16.msrb.mxu3 %v2138_v20  ;;  %v1930_v20 = vor.u32 %v2472_v5, %v1927_v7  ;;  %v2294_v25 = vor.u32 %v2630_v13, %v2291_v16  ;;  %v2235_v5 = vld [vmem:[%s3930_s3 + $0x78] sm:$0xf0]  ;;  %v2217_v16 = vld [vmem:[%s3930_s3 + $0x48] sm:$0xf] }
  0x6f   :  { %v2238_v13 = vor.u32 %v2615_v4, %v2235_v5 }
  0x70   :  { %982 = vmatpush.bf16.msrb.mxu0 %v1990_v26  ;;  %v2298_v26 = vor.u32 %v2633_v18, %v2297_v17  ;;  %v2613_v17 = vld [vmem:[%s3930_s3 + $0x54] sm:$0xf0]  ;;  %v2611_v18 = vld [vmem:[%s3930_s3 + $0x4c] sm:$0xf] }
  0x71   :  { %996 = vmatpush.bf16.msrb.mxu1 %v2118_v27  ;;  %1010 = vmatpush.bf16.msrb.mxu2 %v1994_v28  ;;  %v2273_v27 = vld [vmem:[%s3930_s3 + $0xc0] sm:$0xf]  ;;  %v2628_v28 = vld [vmem:[%s3930_s3 + $0xcc] sm:$0xf0]  ;;  %v2218_v22 = vor.u32 %v2613_v17, %v2217_v16  ;;  %v2433_v16 = vld [vmem:[%s3930_s3 + $0x1b8] sm:$0xf0] }
  0x72   :  { %1024 = vmatpush.bf16.msrb.mxu3 %v2122_v32  ;;  %v2281_v32 = vld [vmem:[%s3930_s3 + $0xc8] sm:$0xf]  ;;  %v2274_v36 = vor.u32 %v2628_v28, %v2273_v27  ;;  %v2195_v27 = vld [vmem:[%s3930_s3 + $0x30] sm:$0xf0] }
  0x73   :  { %v2201_v28 = vld [vmem:[%s3930_s3 + $0x28] sm:$0xf] }
  0x74   :  { %983 = vmatpush.bf16.msrb.mxu0 %v1974_v38  ;;  %v2282_v38 = vor.u32 %v2629_v33, %v2281_v32  ;;  %v2177_v33 = vld [vmem:[%s3930_s3] sm:$0xf] }
  0x75   :  { %997 = vmatpush.bf16.msrb.mxu1 %v2102_v39  ;;  %1011 = vmatpush.bf16.msrb.mxu2 %v1978_v40  ;;  %v2257_v39 = vld [vmem:[%s3930_s3 + $0xa0] sm:$0xf]  ;;  %v2624_v40 = vld [vmem:[%s3930_s3 + $0xac] sm:$0xf0] }
  0x76   :  { %1025 = vmatpush.bf16.msrb.mxu3 %v2106_v44  ;;  %v2265_v44 = vld [vmem:[%s3930_s3 + $0xa8] sm:$0xf]  ;;  %v2258_v46 = vor.u32 %v2624_v40, %v2257_v39 }
  0x77   :  { %v2185_v39 = vld [vmem:[%s3930_s3 + $0x8] sm:$0xf] }
  0x78   :  { %984 = vmatpush.bf16.msrb.mxu0 %v1958_v48  ;;  %v2266_v48 = vor.u32 %v2625_v8, %v2265_v44  ;;  %v2455_v44 = vld [vmem:[%s3930_s3 + $0x1e0] sm:$0xf]  ;;  %v2665_v8 = vld [vmem:[%s3930_s3 + $0x1ec] sm:$0xf0] }
  0x79   :  { %998 = vmatpush.bf16.msrb.mxu1 %v2086_v49  ;;  %1012 = vmatpush.bf16.msrb.mxu2 %v1962_v50  ;;  %v2620_v49 = vld [vmem:[%s3930_s3 + $0x8c] sm:$0xf0]  ;;  %v2618_v50 = vld [vmem:[%s3930_s3 + $0x84] sm:$0xf]  ;;  %v2456_v52 = vor.u32 %v2665_v8, %v2455_v44  ;;  %v2375_v8 = vld [vmem:[%s3930_s3 + $0x140] sm:$0xf] }
  0x7a   :  { %1026 = vmatpush.bf16.msrb.mxu3 %v2090_v54  ;;  %v2619_v54 = vld [vmem:[%s3930_s3 + $0x8c] sm:$0xf]  ;;  %v2246_v58 = vor.u32 %v2618_v50, %v2243_v51 }
  0x7b   :  { %v2254_v0 = vor.u32 %v2619_v54, %v2251_v55  ;;  %v2664_v50 = vld [vmem:[%s3930_s3 + $0x1ec] sm:$0xf] }
  0x7c   :  { %985 = vmatpush.bf16.msrb.mxu0 %v1942_v62  ;;  %v2616_v62 = vld [vmem:[%s3930_s3 + $0x6c] sm:$0xf0] }
  0x7d   :  { %999 = vmatpush.bf16.msrb.mxu1 %v2070_v1  ;;  %1013 = vmatpush.bf16.msrb.mxu2 %v1946_v2  ;;  %v2227_v1 = vld [vmem:[%s3930_s3 + $0x70] sm:$0xf0]  ;;  %v2233_v2 = vld [vmem:[%s3930_s3 + $0x68] sm:$0xf] }
  0x7e   :  { %1027 = vmatpush.bf16.msrb.mxu3 %v2074_v6  ;;  %v2226_v6 = vor.u32 %v2616_v62, %v2225_v60  ;;  %v2230_v7 = vor.u32 %v2614_v63, %v2227_v1  ;;  %v2234_v9 = vor.u32 %v2617_v3, %v2233_v2  ;;  %v2441_v62 = vld [vmem:[%s3930_s3 + $0x1d0] sm:$0xf0]  ;;  %v2447_v63 = vld [vmem:[%s3930_s3 + $0x1c8] sm:$0xf]  ;;  %v2660_v1 = vld [vmem:[%s3930_s3 + $0x1cc] sm:$0xf] }
  0x7f   :  { %v2449_v2 = vld [vmem:[%s3930_s3 + $0x1d8] sm:$0xf0] }
  0x80   :  { %986 = vmatpush.bf16.msrb.mxu0 %v1926_v14  ;;  %v2211_v14 = vld [vmem:[%s3930_s3 + $0x50] sm:$0xf0] }
  0x81   :  { %1000 = vmatpush.bf16.msrb.mxu1 %v2054_v19  ;;  %1014 = vmatpush.bf16.msrb.mxu2 %v1930_v20  ;;  %v2219_v19 = vld [vmem:[%s3930_s3 + $0x58] sm:$0xf0]  ;;  %v2210_v20 = vor.u32 %v2612_v11, %v2209_v10  ;;  %v2214_v21 = vor.u32 %v2610_v12, %v2211_v14  ;;  %v2452_v10 = vor.u32 %v2660_v1, %v2449_v2  ;;  %v2425_v11 = vld [vmem:[%s3930_s3 + $0x1b0] sm:$0xf0]  ;;  %v2431_v12 = vld [vmem:[%s3930_s3 + $0x1a8] sm:$0xf] }
  0x82   :  { %1028 = vmatpush.bf16.msrb.mxu3 %v2058_v23  ;;  %v2193_v23 = vld [vmem:[%s3930_s3 + $0x20] sm:$0xf]  ;;  %v2656_v14 = vld [vmem:[%s3930_s3 + $0x1ac] sm:$0xf]  ;;  %v2369_v2 = vld [vmem:[%s3930_s3 + $0x138] sm:$0xf0] }
  0x83   :  { %987 = vmatmul.bf16.vlgmr.msrb.gmra.mxu0 %v3337_v57  ;;  %v2640_v1 = vld [vmem:[%s3930_s3 + $0x12c] sm:$0xf] }
  0x84   :  { %1235 = vmatpush.bf16.msra.mxu0 %v2290_v24  ;;  %1015 = vmatmul.bf16.vlgmr.msrb.gmra.mxu2 %v3337_v57  ;;  %v2241_v57 = vld [vmem:[%s3930_s3 + $0x80] sm:$0xf]  ;;  %v2608_v24 = vld [vmem:[%s3930_s3 + $0x2c] sm:$0xf0] }
  0x85   :  { %1249 = vmatpush.bf16.msra.mxu1 %v2294_v25  ;;  %1263 = vmatpush.bf16.msra.mxu2 %v2298_v26  ;;  %v2242_v56 = vor.u32 %v2620_v49, %v2241_v57  ;;  %v2606_v25 = vld [vmem:[%s3930_s3 + $0x24] sm:$0xf]  ;;  %v2222_v26 = vor.u32 %v2611_v18, %v2219_v19  ;;  %v2194_v32 = vor.u32 %v2608_v24, %v2193_v23  ;;  %v2409_v24 = vld [vmem:[%s3930_s3 + $0x190] sm:$0xf0] }
  0x86   :  { %1277 = vmatpush.bf16.msra.mxu3 %v2302_v30  ;;  %1001 = vmatmul.bf16.vlgmr.msrb.gmra.mxu1 %v3348_v61  ;;  %v2607_v30 = vld [vmem:[%s3930_s3 + $0x2c] sm:$0xf]  ;;  %v2198_v35 = vor.u32 %v2606_v25, %v2195_v27  ;;  %v2186_v49 = vor.u32 %v2605_v41, %v2185_v39  ;;  %v2436_v23 = vor.u32 %v2656_v14, %v2433_v16  ;;  %v2415_v25 = vld [vmem:[%s3930_s3 + $0x188] sm:$0xf]  ;;  %v2345_v14 = vld [vmem:[%s3930_s3 + $0x110] sm:$0xf0] }
  0x87   :  { %1029 = vmatmul.bf16.vlgmr.msrb.gmra.mxu3 %v3348_v61  ;;  %v2270_v61 = vor.u32 %v2623_v45, %v2267_v15  ;;  %v2206_v40 = vor.u32 %v2607_v30, %v2203_v31  ;;  %v2663_v45 = vld [vmem:[%s3930_s3 + $0x1e4] sm:$0xf]  ;;  %v2178_v15 = vor.u32 %v2604_v34, %v2177_v33  ;;  %v2652_v27 = vld [vmem:[%s3930_s3 + $0x18c] sm:$0xf]  ;;  %v2649_v33 = vld [vmem:[%s3930_s3 + $0x16c] sm:$0xf0] }
  0x88   :  { %1236 = vmatpush.bf16.msra.mxu0 %v2274_v36  ;;  %v2202_v36 = vor.u32 %v2609_v29, %v2201_v28  ;;  %v2417_v28 = vld [vmem:[%s3930_s3 + $0x198] sm:$0xf0]  ;;  %v2647_v34 = vld [vmem:[%s3930_s3 + $0x164] sm:$0xf]  ;;  %v2648_v39 = vld [vmem:[%s3930_s3 + $0x16c] sm:$0xf] }
  0x89   :  { %1250 = vmatpush.bf16.msra.mxu1 %v2278_v37  ;;  %1264 = vmatpush.bf16.msra.mxu2 %v2282_v38  ;;  %v2602_v37 = vld [vmem:[%s3930_s3 + $0x4] sm:$0xf]  ;;  %v2179_v38 = vld [vmem:[%s3930_s3 + $0x10] sm:$0xf0]  ;;  %v2351_v16 = vld [vmem:[%s3930_s3 + $0x108] sm:$0xf] }
  0x8a   :  { %1278 = vmatpush.bf16.msra.mxu3 %v2286_v42  ;;  %v2603_v42 = vld [vmem:[%s3930_s3 + $0xc] sm:$0xf]  ;;  %v2182_v57 = vor.u32 %v2602_v37, %v2179_v38  ;;  %v2399_v37 = vld [vmem:[%s3930_s3 + $0x168] sm:$0xf]  ;;  %v2650_v38 = vld [vmem:[%s3930_s3 + $0x174] sm:$0xf0] }
  0x8b   :  { %v2190_v51 = vor.u32 %v2603_v42, %v2187_v43  ;;  %v2400_v44 = vor.u32 %v2650_v38, %v2399_v37 }
  0x8c   :  { %1237 = vmatpush.bf16.msra.mxu0 %v2258_v46  ;;  %v2457_v46 = vld [vmem:[%s3930_s3 + $0x1f0] sm:$0xf0] }
  0x8d   :  { %1251 = vmatpush.bf16.msra.mxu1 %v2262_v47  ;;  %1265 = vmatpush.bf16.msra.mxu2 %v2266_v48  ;;  %v2463_v47 = vld [vmem:[%s3930_s3 + $0x1e8] sm:$0xf]  ;;  %v2666_v48 = vld [vmem:[%s3930_s3 + $0x1f4] sm:$0xf0]  ;;  %v2460_v54 = vor.u32 %v2663_v45, %v2457_v46  ;;  %v2645_v45 = vld [vmem:[%s3930_s3 + $0x14c] sm:$0xf0] }
  0x8e   :  { %1279 = vmatpush.bf16.msra.mxu3 %v2270_v61  ;;  %v2465_v61 = vld [vmem:[%s3930_s3 + $0x1f8] sm:$0xf0]  ;;  %v2464_v55 = vor.u32 %v2666_v48, %v2463_v47  ;;  %v2377_v47 = vld [vmem:[%s3930_s3 + $0x150] sm:$0xf0]  ;;  %v2383_v48 = vld [vmem:[%s3930_s3 + $0x148] sm:$0xf] }
  0x8f   :  { %v2468_v60 = vor.u32 %v2664_v50, %v2465_v61  ;;  %v2385_v50 = vld [vmem:[%s3930_s3 + $0x158] sm:$0xf0] }
  0x90   :  { %1238 = vmatpush.bf16.msra.mxu0 %v2242_v56  ;;  %v2439_v56 = vld [vmem:[%s3930_s3 + $0x1c0] sm:$0xf] }
  0x91   :  { %1252 = vmatpush.bf16.msra.mxu1 %v2246_v58  ;;  %1266 = vmatpush.bf16.msra.mxu2 %v2250_v59  ;;  %v2661_v58 = vld [vmem:[%s3930_s3 + $0x1cc] sm:$0xf0]  ;;  %v2659_v59 = vld [vmem:[%s3930_s3 + $0x1c4] sm:$0xf] }
  0x92   :  { %1280 = vmatpush.bf16.msra.mxu3 %v2254_v0  ;;  %v2662_v0 = vld [vmem:[%s3930_s3 + $0x1d4] sm:$0xf0]  ;;  %v2440_v3 = vor.u32 %v2661_v58, %v2439_v56  ;;  %v2444_v4 = vor.u32 %v2659_v59, %v2441_v62  ;;  %v2641_v56 = vld [vmem:[%s3930_s3 + $0x12c] sm:$0xf0]  ;;  %v2639_v58 = vld [vmem:[%s3930_s3 + $0x124] sm:$0xf] }
  0x93   :  { %v2448_v5 = vor.u32 %v2662_v0, %v2447_v63  ;;  %v2367_v62 = vld [vmem:[%s3930_s3 + $0x128] sm:$0xf]  ;;  %v2642_v63 = vld [vmem:[%s3930_s3 + $0x134] sm:$0xf0] }
  0x94   :  { %1239 = vmatpush.bf16.msra.mxu0 %v2226_v6  ;;  %v2423_v6 = vld [vmem:[%s3930_s3 + $0x1a0] sm:$0xf] }
  0x95   :  { %1253 = vmatpush.bf16.msra.mxu1 %v2230_v7  ;;  %1267 = vmatpush.bf16.msra.mxu2 %v2234_v9  ;;  %v2657_v7 = vld [vmem:[%s3930_s3 + $0x1ac] sm:$0xf0]  ;;  %v2655_v9 = vld [vmem:[%s3930_s3 + $0x1a4] sm:$0xf] }
  0x96   :  { %1281 = vmatpush.bf16.msra.mxu3 %v2238_v13  ;;  %v2658_v13 = vld [vmem:[%s3930_s3 + $0x1b4] sm:$0xf0]  ;;  %v2424_v17 = vor.u32 %v2657_v7, %v2423_v6  ;;  %v2428_v18 = vor.u32 %v2655_v9, %v2425_v11  ;;  %v2368_v7 = vor.u32 %v2642_v63, %v2367_v62  ;;  %v2343_v9 = vld [vmem:[%s3930_s3 + $0x100] sm:$0xf]  ;;  %v2635_v11 = vld [vmem:[%s3930_s3 + $0x104] sm:$0xf] }
  0x97   :  { %v2432_v19 = vor.u32 %v2658_v13, %v2431_v12  ;;  %v2372_v13 = vor.u32 %v2640_v1, %v2369_v2 }
  0x98   :  { %1240 = vmatpush.bf16.msra.mxu0 %v2210_v20  ;;  %v2407_v20 = vld [vmem:[%s3930_s3 + $0x180] sm:$0xf] }
  0x99   :  { %1254 = vmatpush.bf16.msra.mxu1 %v2214_v21  ;;  %1268 = vmatpush.bf16.msra.mxu2 %v2218_v22  ;;  %v2653_v21 = vld [vmem:[%s3930_s3 + $0x18c] sm:$0xf0]  ;;  %v2651_v22 = vld [vmem:[%s3930_s3 + $0x184] sm:$0xf] }
  0x9a   :  { %1282 = vmatpush.bf16.msra.mxu3 %v2222_v26  ;;  %v2654_v26 = vld [vmem:[%s3930_s3 + $0x194] sm:$0xf0]  ;;  %v2408_v29 = vor.u32 %v2653_v21, %v2407_v20  ;;  %v2412_v30 = vor.u32 %v2651_v22, %v2409_v24 }
  0x9b   :  { %v2416_v31 = vor.u32 %v2654_v26, %v2415_v25 }
  0x9c   :  { %1241 = vmatpush.bf16.msra.mxu0 %v2194_v32  ;;  %v2391_v32 = vld [vmem:[%s3930_s3 + $0x160] sm:$0xf] }
  0x9d   :  { %1255 = vmatpush.bf16.msra.mxu1 %v2198_v35  ;;  %1269 = vmatpush.bf16.msra.mxu2 %v2202_v36  ;;  %v2420_v35 = vor.u32 %v2652_v27, %v2417_v28  ;;  %v2393_v36 = vld [vmem:[%s3930_s3 + $0x170] sm:$0xf0]  ;;  %v2392_v41 = vor.u32 %v2649_v33, %v2391_v32  ;;  %v2634_v27 = vld [vmem:[%s3931_s1 + $0x8] sm:$0xff] }
  0x9e   :  { %1283 = vmatpush.bf16.msra.mxu3 %v2206_v40  ;;  %v2401_v40 = vld [vmem:[%s3930_s3 + $0x178] sm:$0xf0]  ;;  %v2396_v43 = vor.u32 %v2647_v34, %v2393_v36 }
  0x9f   :  { %v2404_v46 = vor.u32 %v2648_v39, %v2401_v40 }
  0xa0   :  { %1242 = vmatpush.bf16.msra.mxu0 %v2178_v15  ;;  %v490_v42 = vpop.f32.mrf.mxu0  ;;  %v2643_v15 = vld [vmem:[%s3930_s3 + $0x144] sm:$0xf] }
  0xa1   :  { %1256 = vmatpush.bf16.msra.mxu1 %v2182_v57  ;;  %1270 = vmatpush.bf16.msra.mxu2 %v2186_v49  ;;  %v2646_v57 = vld [vmem:[%s3930_s3 + $0x154] sm:$0xf0]  ;;  %v2644_v49 = vld [vmem:[%s3930_s3 + $0x14c] sm:$0xf] }
  0xa2   :  { %1284 = vmatpush.bf16.msra.mxu3 %v2190_v51  ;;  %v2376_v51 = vor.u32 %v2645_v45, %v2375_v8  ;;  %v2388_v59 = vor.u32 %v2644_v49, %v2385_v50 }
  0xa3   :  { %1243 = vmatmul.bf16.vlgmr.msra.gmra.mxu0 %v2601_v53  ;;  %v504_v61 = vpop.f32.mrf.mxu1 }
  0xa4   :  { %1501 = vmatpush.bf16.msrb.mxu0 %v2456_v52  ;;  %1257 = vmatmul.bf16.vlgmr.msra.gmra.mxu1 %v2601_v53  ;;  %v3847_v52 = vadd.f32 %v504_v61, %v490_v42 }
  0xa5   :  { %1515 = vmatpush.bf16.msrb.mxu1 %v2460_v54  ;;  %1529 = vmatpush.bf16.msrb.mxu2 %v2464_v55  ;;  %v2384_v54 = vor.u32 %v2646_v57, %v2383_v48  ;;  %v2359_v55 = vld [vmem:[%s3930_s3 + $0x120] sm:$0xf] }
  0xa6   :  { %1543 = vmatpush.bf16.msrb.mxu3 %v2468_v60  ;;  %1271 = vmatmul.bf16.vlgmr.msra.gmra.mxu2 %v2601_v53  ;;  %v2361_v60 = vld [vmem:[%s3930_s3 + $0x130] sm:$0xf0] }
  0xa7   :  { %1285 = vmatmul.bf16.vlgmr.msra.gmra.mxu3 %v2601_v53  ;;  %v2380_v53 = vor.u32 %v2643_v15, %v2377_v47  ;;  %v518_v0 = vpop.f32.mrf.mxu2  ;;  %v2364_v6 = vor.u32 %v2639_v58, %v2361_v60 }
  0xa8   :  { %1502 = vmatpush.bf16.msrb.mxu0 %v2440_v3  ;;  %v492_v12 = vpop.f32.mrf.mxu0 }
  0xa9   :  { %1516 = vmatpush.bf16.msrb.mxu1 %v2444_v4  ;;  %1530 = vmatpush.bf16.msrb.mxu2 %v2448_v5  ;;  %v2360_v4 = vor.u32 %v2641_v56, %v2359_v55 }
  0xaa   :  { %1544 = vmatpush.bf16.msrb.mxu3 %v2452_v10  ;;  %v532_v3 = vpop.f32.mrf.mxu3  ;;  %v2637_v10 = vld [vmem:[%s3930_s3 + $0x10c] sm:$0xf0] }
  0xab   :  { %v3873_v5 = vadd.f32 %v532_v3, %v518_v0  ;;  %v506_v20 = vpop.f32.mrf.mxu1  ;;  %v2344_v21 = vor.u32 %v2637_v10, %v2343_v9 }
  0xac   :  { %1503 = vmatpush.bf16.msrb.mxu0 %v2424_v17  ;;  %v2638_v17 = vld [vmem:[%s3930_s3 + $0x114] sm:$0xf0]  ;;  %v507_v22 = vadd.f32 %v506_v20, %v492_v12 }
  0xad   :  { %1517 = vmatpush.bf16.msrb.mxu1 %v2428_v18  ;;  %1531 = vmatpush.bf16.msrb.mxu2 %v2432_v19  ;;  %v2636_v18 = vld [vmem:[%s3930_s3 + $0x10c] sm:$0xf]  ;;  %v2353_v19 = vld [vmem:[%s3930_s3 + $0x118] sm:$0xf0]  ;;  %v2352_v24 = vor.u32 %v2638_v17, %v2351_v16 }
  0xae   :  { %1545 = vmatpush.bf16.msrb.mxu3 %v2436_v23  ;;  %v2348_v23 = vor.u32 %v2635_v11, %v2345_v14  ;;  %v2356_v25 = vor.u32 %v2636_v18, %v2353_v19 }
  0xaf   :  { %v520_v26 = vpop.f32.mrf.mxu2 }
  0xb0   :  { %1504 = vmatpush.bf16.msrb.mxu0 %v2408_v29 }
  0xb1   :  { %1518 = vmatpush.bf16.msrb.mxu1 %v2412_v30  ;;  %1532 = vmatpush.bf16.msrb.mxu2 %v2416_v31 }
  0xb2   :  { %1546 = vmatpush.bf16.msrb.mxu3 %v2420_v35  ;;  %v534_v28 = vpop.f32.mrf.mxu3 }
  0xb3   :  { %v535_v29 = vadd.f32 %v534_v28, %v520_v26 }
  0xb4   :  { %1505 = vmatpush.bf16.msrb.mxu0 %v2392_v41 }
  0xb5   :  { %1519 = vmatpush.bf16.msrb.mxu1 %v2396_v43  ;;  %1533 = vmatpush.bf16.msrb.mxu2 %v2400_v44 }
  0xb6   :  { %1547 = vmatpush.bf16.msrb.mxu3 %v2404_v46 }
  0xb8   :  { %1506 = vmatpush.bf16.msrb.mxu0 %v2376_v51 }
  0xb9   :  { %1520 = vmatpush.bf16.msrb.mxu1 %v2380_v53  ;;  %1534 = vmatpush.bf16.msrb.mxu2 %v2384_v54 }
  0xba   :  { %1548 = vmatpush.bf16.msrb.mxu3 %v2388_v59 }
  0xbc   :  { %1507 = vmatpush.bf16.msrb.mxu0 %v2360_v4 }
  0xbd   :  { %1521 = vmatpush.bf16.msrb.mxu1 %v2364_v6  ;;  %1535 = vmatpush.bf16.msrb.mxu2 %v2368_v7 }
  0xbe   :  { %1549 = vmatpush.bf16.msrb.mxu3 %v2372_v13 }
  0xc0   :  { %1508 = vmatpush.bf16.msrb.mxu0 %v2344_v21  ;;  %v546_v30 = vpop.f32.mrf.mxu0 }
  0xc1   :  { %1522 = vmatpush.bf16.msrb.mxu1 %v2348_v23  ;;  %1536 = vmatpush.bf16.msrb.mxu2 %v2352_v24 }
  0xc2   :  { %1550 = vmatpush.bf16.msrb.mxu3 %v2356_v25 }
  0xc3   :  { %1509 = vmatmul.bf16.vlgmr.msrb.gmra.mxu0 %v2634_v27  ;;  %v560_v31 = vpop.f32.mrf.mxu1 }
  0xc4   :  { %1523 = vmatmul.bf16.vlgmr.msrb.gmra.mxu1 %v2634_v27  ;;  %1537 = vmatmul.bf16.vlgmr.msrb.gmra.mxu2 %v2634_v27  ;;  %v561_v62 = vadd.f32 %v560_v31, %v546_v30 }
  0xc5   :  { %1551 = vmatmul.bf16.vlgmr.msrb.gmra.mxu3 %v2634_v27 }
  0xc7   :  { %v574_v32 = vpop.f32.mrf.mxu2 }
  0xc8   :  { %v548_v34 = vpop.f32.mrf.mxu0 }
  0xca   :  { %v588_v33 = vpop.f32.mrf.mxu3 }
  0xcb   :  { %v562_v35 = vpop.f32.mrf.mxu1  ;;  %v589_v0 = vadd.f32 %v588_v33, %v574_v32 }
  0xcc   :  { %v563_v17 = vadd.f32 %v562_v35, %v548_v34 }
  0xcf   :  { %v576_v36 = vpop.f32.mrf.mxu2 }
  0xd2   :  { %v590_v37 = vpop.f32.mrf.mxu3 }
  0xd3   :  { %v591_v20 = vadd.f32 %v590_v37, %v576_v36 }
  0xe0   :  { %v932_v38 = vpop.f32.mrf.mxu0 }
  0xe1   :  { %v933_v56 = vadd.f32 %v932_v38, %v3847_v52 }
  0xe3   :  { %v946_v39 = vpop.f32.mrf.mxu1 }
  0xe4   :  { %v947_v60 = vadd.f32 %v946_v39, %v933_v56 }
  0xe7   :  { %v960_v40 = vpop.f32.mrf.mxu2 }
  0xe8   :  { %v934_v42 = vpop.f32.mrf.mxu0  ;;  %v961_v59 = vadd.f32 %v960_v40, %v3873_v5 }
  0xe9   :  { %v935_v9 = vadd.f32 %v934_v42, %v507_v22 }
  0xea   :  { %v974_v41 = vpop.f32.mrf.mxu3 }
  0xeb   :  { %v948_v43 = vpop.f32.mrf.mxu1  ;;  %v975_v63 = vadd.f32 %v974_v41, %v961_v59 }
  0xec   :  { %v949_v5 = vadd.f32 %v948_v43, %v935_v9 }
  0xef   :  { %v962_v44 = vpop.f32.mrf.mxu2 }
  0xf0   :  { %v963_v13 = vadd.f32 %v962_v44, %v535_v29 }
  0xf2   :  { %v976_v8 = vpop.f32.mrf.mxu3 }
  0xf3   :  { %v977_v18 = vadd.f32 %v976_v8, %v963_v13 }
 0x100   :  { %v988_v45 = vpop.f32.mrf.mxu0 }
 0x101   :  { %v989_v3 = vadd.f32 %v988_v45, %v561_v62 }
 0x103   :  { %v1002_v15 = vpop.f32.mrf.mxu1 }
 0x104   :  { %v1003_v52 = vadd.f32 %v1002_v15, %v989_v3 }
 0x107   :  { %v1016_v46 = vpop.f32.mrf.mxu2 }
 0x108   :  { %v990_v48 = vpop.f32.mrf.mxu0  ;;  %v1017_v10 = vadd.f32 %v1016_v46, %v589_v0 }
 0x109   :  { %v991_v24 = vadd.f32 %v990_v48, %v563_v17 }
 0x10a   :  { %v1030_v47 = vpop.f32.mrf.mxu3 }
 0x10b   :  { %v1004_v57 = vpop.f32.mrf.mxu1  ;;  %v1031_v16 = vadd.f32 %v1030_v47, %v1017_v10 }
 0x10c   :  { %v1005_v34 = vadd.f32 %v1004_v57, %v991_v24 }
 0x10f   :  { %v1018_v49 = vpop.f32.mrf.mxu2 }
 0x110   :  { %v1019_v29 = vadd.f32 %v1018_v49, %v591_v20 }
 0x112   :  { %v1032_v50 = vpop.f32.mrf.mxu3 }
 0x113   :  { %v1033_v35 = vadd.f32 %v1032_v50, %v1019_v29 }
 0x120   :  { %v1244_v61 = vpop.f32.mrf.mxu0 }
 0x121   :  { %v1258_v51 = vpop.f32.mrf.mxu1  ;;  %v1291_v1 = vadd.f32 %v1244_v61, %v947_v60 }
 0x122   :  { %v1292_v4 = vadd.f32 %v1258_v51, %v975_v63 }
 0x128   :  { %v1246_v55 = vpop.f32.mrf.mxu0 }
 0x129   :  { %v1272_v53 = vpop.f32.mrf.mxu2  ;;  %v1260_v58 = vpop.f32.mrf.mxu1  ;;  %v1295_v22 = vadd.f32 %v1246_v55, %v949_v5 }
 0x12a   :  { %v1286_v54 = vpop.f32.mrf.mxu3  ;;  %v1293_v19 = vadd.f32 %v1272_v53, %v1003_v52  ;;  %v1296_v25 = vadd.f32 %v1260_v58, %v977_v18 }
 0x12b   :  { %v1294_v21 = vadd.f32 %v1286_v54, %v1031_v16 }
 0x131   :  { %v1274_v2 = vpop.f32.mrf.mxu2 }
 0x132   :  { %v1288_v6 = vpop.f32.mrf.mxu3  ;;  %v1297_v36 = vadd.f32 %v1274_v2, %v1005_v34 }
 0x133   :  { %v1298_v37 = vadd.f32 %v1288_v6, %v1033_v35 }
 0x140   :  { %v1510_v7 = vpop.f32.mrf.mxu0 }
 0x141   :  { %v1557_v11 = vadd.f32 %v1510_v7, %v1291_v1  ;;  %v1524_v12 = vpop.f32.mrf.mxu1 }
 0x142   :  { %v1558_v14 = vadd.f32 %v1524_v12, %v1292_v4 }
 0x143   :  { %1565 = vst [vmem:[%s3932_s4] sm:$0xff] %v1557_v11 }
 0x144   :  { %1566 = vst [vmem:[%s3932_s4 + $0x8] sm:$0xff] %v1558_v14 }
 0x147   :  { %v1538_v23 = vpop.f32.mrf.mxu2 }
 0x148   :  { %v1559_v26 = vadd.f32 %v1538_v23, %v1293_v19  ;;  %v1552_v27 = vpop.f32.mrf.mxu3  ;;  %v1512_v28 = vpop.f32.mrf.mxu0 }
 0x149   :  { %v1560_v30 = vadd.f32 %v1552_v27, %v1294_v21  ;;  %v1561_v31 = vadd.f32 %v1512_v28, %v1295_v22  ;;  %v1526_v32 = vpop.f32.mrf.mxu1 }
 0x14a   :  { %1567 = vst [vmem:[%s3932_s4 + $0x10] sm:$0xff] %v1559_v26  ;;  %v1562_v33 = vadd.f32 %v1526_v32, %v1296_v25 }
 0x14b   :  { %1568 = vst [vmem:[%s3932_s4 + $0x18] sm:$0xff] %v1560_v30 }
 0x14c   :  { %1569 = vst [vmem:[%s3932_s4 + $0x20] sm:$0xff] %v1561_v31 }
 0x14d   :  { %1570 = vst [vmem:[%s3932_s4 + $0x28] sm:$0xff] %v1562_v33 }
 0x14f   :  { %v1540_v38 = vpop.f32.mrf.mxu2 }
 0x150   :  { %v1563_v39 = vadd.f32 %v1540_v38, %v1297_v36  ;;  %v1554_v40 = vpop.f32.mrf.mxu3 }
 0x151   :  { %v1564_v41 = vadd.f32 %v1554_v40, %v1298_v37 }
 0x152   :  { %1571 = vst [vmem:[%s3932_s4 + $0x30] sm:$0xff] %v1563_v39 }
 0x153   :  { %1572 = vst [vmem:[%s3932_s4 + $0x38] sm:$0xff] %v1564_v41 }

</bundles_post_ra>
